<compile_context>
chip_gen: v5e
topology: v5e:2x2
jax: 0.10.0
libtpu: 0.0.40
codegen_flags: <defaults>
</compile_context>

<pallas_src>
import jax
import jax.numpy as jnp
from jax.experimental import pallas as pl
from jax.experimental.pallas import tpu as pltpu

CIN = 896
COUT = 195

_ITEM = 4                      # float32 bytes
_TILE_CAP = 2048               # spatial tile cap (~19 MiB pipeline footprint)
_SMALL_VMEM_BUDGET = 16 * 2**20
_SMALL_MAX_BATCH = 8


# ---------------------------------------------------------------------------
# Kernels
# ---------------------------------------------------------------------------
def _conv1x1_tile_kernel(w_ref, x_ref, o_ref):
    # w_ref: (COUT, CIN)   x_ref: (1, CIN, thw)   o_ref: (1, COUT, thw)
    o_ref[0] = jnp.dot(w_ref[...], x_ref[0], preferred_element_type=jnp.float32)


def _conv1x1_small_kernel(w_ref, x_ref, o_ref):
    # Whole problem resident in VMEM; static (unrolled) loop over a small batch.
    # w_ref: (COUT, CIN)   x_ref: (N, CIN, HW)   o_ref: (N, COUT, HW)
    for b in range(x_ref.shape[0]):
        o_ref[b] = jnp.dot(w_ref[...], x_ref[b], preferred_element_type=jnp.float32)


# ---------------------------------------------------------------------------
# Tiling / VMEM helpers
# ---------------------------------------------------------------------------
def _pick_hw_tile(hw, n):
    """Largest lane-dense (multiple-of-128) divisor of hw under the cap; fall
    back to the full extent (always a legal block dim) for unaligned hw."""
    if hw % 128 == 0 and hw > _TILE_CAP:
        tile = 128
        for t in range(_TILE_CAP, 127, -128):
            if hw % t == 0:
                tile = t
                break
    else:
        # hw <= cap (use full extent, lane-dense if hw % 128 == 0) or hw not a
        # multiple of 128 (full extent is the only universally legal block).
        # TODO(synk): for huge HW that is not a multiple of 128, pad HW up to a
        # 128 multiple in the wrapper instead of taking a full-extent block.
        tile = hw
    # v7x megacore: a single-block grid idles one TensorCore; split the tile
    # into lane-dense halves when that is the only way to get >=2 blocks.
    if n * (hw // tile) < 2 and tile % 256 == 0:
        tile //= 2
    return tile


def _vmem_limit_bytes(hw_tile):
    x_tile = CIN * hw_tile * _ITEM
    o_tile = COUT * hw_tile * _ITEM
    w_bytes = COUT * CIN * _ITEM
    needed = 2 * (x_tile + o_tile) + 2 * w_bytes   # double-buffered pipeline
    return int(min(112 * 2**20, max(32 * 2**20, needed + (8 << 20))))


def _cost(n, hw):
    return pl.CostEstimate(
        flops=2 * n * hw * CIN * COUT,
        transcendentals=0,
        bytes_accessed=(n * CIN * hw + COUT * CIN + n * COUT * hw) * _ITEM,
    )


# ---------------------------------------------------------------------------
# pallas_call wrappers
# ---------------------------------------------------------------------------
def _conv1x1_tiled(x3d, w2d, hw_tile):
    N, K, HW = x3d.shape
    assert HW % hw_tile == 0
    grid = (N, HW // hw_tile)
    return pl.pallas_call(
        _conv1x1_tile_kernel,
        out_shape=jax.ShapeDtypeStruct((N, COUT, HW), jnp.float32),
        grid_spec=pltpu.PrefetchScalarGridSpec(
            num_scalar_prefetch=0,
            grid=grid,
            in_specs=[
                pl.BlockSpec((COUT, K), lambda n, s: (0, 0)),            # weight (resident)
                pl.BlockSpec((1, K, hw_tile), lambda n, s: (n, 0, s)),   # x slab
            ],
            out_specs=pl.BlockSpec((1, COUT, hw_tile), lambda n, s: (n, 0, s)),
        ),
        compiler_params=pltpu.CompilerParams(
            dimension_semantics=("parallel", "parallel"),
            vmem_limit_bytes=_vmem_limit_bytes(hw_tile),
        ),
        cost_estimate=_cost(N, HW),
    )(w2d, x3d)


def _conv1x1_small(x3d, w2d):
    N, K, HW = x3d.shape
    return pl.pallas_call(
        _conv1x1_small_kernel,
        out_shape=jax.ShapeDtypeStruct((N, COUT, HW), jnp.float32),
        grid_spec=pltpu.PrefetchScalarGridSpec(
            num_scalar_prefetch=0,
            grid=(1,),
            in_specs=[
                pl.BlockSpec((COUT, K), lambda i: (0, 0)),
                pl.BlockSpec((N, K, HW), lambda i: (0, 0, 0)),
            ],
            out_specs=pl.BlockSpec((N, COUT, HW), lambda i: (0, 0, 0)),
        ),
        compiler_params=pltpu.CompilerParams(
            dimension_semantics=("arbitrary",),
        ),
        cost_estimate=_cost(N, HW),
    )(w2d, x3d)


# ---------------------------------------------------------------------------
# Module forward
# ---------------------------------------------------------------------------
def prepare_weight(weight):
    """Conv2d weight (COUT, CIN, 1, 1) -> (COUT, CIN). Call once, outside jit."""
    return jnp.asarray(weight, jnp.float32).reshape(COUT, CIN)


def module1566_forward(x_nchw, w2d):
    """x_nchw: (N, 896, H, W) float32; w2d: (195, 896) float32."""
    N, C, H, W = x_nchw.shape
    assert C == CIN and w2d.shape == (COUT, CIN)
    HW = H * W
    x3d = x_nchw.reshape(N, CIN, HW)                  # free reshape (NCHW kept)

    small_bytes = (N * (CIN + COUT) * HW + COUT * CIN) * _ITEM
    if ((HW % 128 != 0 or HW < 256)
            and N <= _SMALL_MAX_BATCH
            and small_bytes <= _SMALL_VMEM_BUDGET):
        out3d = _conv1x1_small(x3d, w2d)              # one block, whole batch
    else:
        hw_tile = _pick_hw_tile(HW, N)
        out3d = _conv1x1_tiled(x3d, w2d, hw_tile)     # (N, COUT, HW) directly

    return out3d.reshape(N, COUT, H, W)


if __name__ == "__main__":
    key = jax.random.PRNGKey(0)
    kx, kw, kx2 = jax.random.split(key, 3)

    # Deterministic Kaiming-uniform-like init for Conv2d weight (bias=False).
    fan_in = CIN * 1 * 1
    bound = 1.0 / (fan_in ** 0.5)
    weight = jax.random.uniform(
        kw, (COUT, CIN, 1, 1), minval=-bound, maxval=bound, dtype=jnp.float32
    )
    w2d = prepare_weight(weight)           # hoisted: prepared once, outside jit
    w2d_flat = weight.reshape(COUT, CIN)
    fwd = jax.jit(module1566_forward)

    # Case 1: the original small test (HW=64) -> single-block small path.
    Nb, H, Wd = 2, 8, 8
    x = jax.random.normal(kx, (Nb, CIN, H, Wd), dtype=jnp.float32)
    out = fwd(x, w2d)
    jax.block_until_ready(out)
    ref = jnp.einsum("nchw,oc->nohw", x, w2d_flat)
    assert out.shape == (Nb, COUT, H, Wd)
    assert jnp.allclose(out, ref, atol=1e-4, rtol=1e-4)

    # Case 2: lane-dense spatial (HW=256) -> tiled grid path.
    Nb2, H2, W2 = 2, 16, 16
    x2 = jax.random.normal(kx2, (Nb2, CIN, H2, W2), dtype=jnp.float32)
    out2 = fwd(x2, w2d)
    jax.block_until_ready(out2)
    ref2 = jnp.einsum("nchw,oc->nohw", x2, w2d_flat)
    assert out2.shape == (Nb2, COUT, H2, W2)
    assert jnp.allclose(out2, ref2, atol=1e-4, rtol=1e-4)

    print("KERNEL_OK")
</pallas_src>

<mosaic_0001>
module attributes {stable_mosaic.version = 11 : i64} {
  func.func @_conv1x1_small_kernel(%arg0: i32, %arg1: memref<195x896xf32, #tpu.memory_space<vmem>>, %arg2: memref<2x896x64xf32, #tpu.memory_space<vmem>>, %arg3: memref<2x195x64xf32, #tpu.memory_space<vmem>>) attributes {dimension_semantics = [#tpu.dimension_semantics<arbitrary>], iteration_bounds = array<i64: 1>, scalar_prefetch = 0 : i64, scratch_operands = 0 : i64, tpu.core_type = #tpu.core_type<tc>, window_params = [{pipeline_mode = #tpu.pipeline_mode<synchronous>, transform_indices = @transform_0, window_bounds = array<i64: 195, 896>}, {pipeline_mode = #tpu.pipeline_mode<synchronous>, transform_indices = @transform_1, window_bounds = array<i64: 2, 896, 64>}, {pipeline_mode = #tpu.pipeline_mode<synchronous>, transform_indices = @transform_2, window_bounds = array<i64: 2, 195, 64>}]} {
    %c0 = arith.constant 0 : index
    %c0_0 = arith.constant 0 : index
    %0 = vector.load %arg1[%c0, %c0_0] : memref<195x896xf32, #tpu.memory_space<vmem>>, vector<195x896xf32>
    %c0_1 = arith.constant 0 : index
    %c0_2 = arith.constant 0 : index
    %c0_3 = arith.constant 0 : index
    %1 = vector.load %arg2[%c0_1, %c0_2, %c0_3] : memref<2x896x64xf32, #tpu.memory_space<vmem>>, vector<1x896x64xf32>
    %2 = vector.shape_cast %1 : vector<1x896x64xf32> to vector<896x64xf32>
    %cst = arith.constant dense<0.000000e+00> : vector<195x64xf32>
    %3 = tpu.matmul %0, %2, %cst {dimension_numbers = #tpu.dot_dimension_numbers<[1], [0], [0], [1], [0, 0, 1, 1], [], []>} : vector<195x896xf32>, vector<896x64xf32>, vector<195x64xf32> -> vector<195x64xf32>
    %c0_4 = arith.constant 0 : index
    %c0_5 = arith.constant 0 : index
    %c0_6 = arith.constant 0 : index
    %4 = vector.load %arg3[%c0_4, %c0_5, %c0_6] : memref<2x195x64xf32, #tpu.memory_space<vmem>>, vector<1x195x64xf32>
    %5 = vector.shape_cast %4 : vector<1x195x64xf32> to vector<195x64xf32>
    %6 = vector.shape_cast %3 : vector<195x64xf32> to vector<1x195x64xf32>
    tpu.vector_store %arg3[%c0_4, %c0_5, %c0_6], %6 {strides = array<i32>} : memref<2x195x64xf32, #tpu.memory_space<vmem>>, vector<1x195x64xf32>,
    %c0_7 = arith.constant 0 : index
    %c0_8 = arith.constant 0 : index
    %7 = vector.load %arg1[%c0_7, %c0_8] : memref<195x896xf32, #tpu.memory_space<vmem>>, vector<195x896xf32>
    %c1 = arith.constant 1 : index
    %c0_9 = arith.constant 0 : index
    %c0_10 = arith.constant 0 : index
    %8 = vector.load %arg2[%c1, %c0_9, %c0_10] : memref<2x896x64xf32, #tpu.memory_space<vmem>>, vector<1x896x64xf32>
    %9 = vector.shape_cast %8 : vector<1x896x64xf32> to vector<896x64xf32>
    %cst_11 = arith.constant dense<0.000000e+00> : vector<195x64xf32>
    %10 = tpu.matmul %7, %9, %cst_11 {dimension_numbers = #tpu.dot_dimension_numbers<[1], [0], [0], [1], [0, 0, 1, 1], [], []>} : vector<195x896xf32>, vector<896x64xf32>, vector<195x64xf32> -> vector<195x64xf32>
    %c1_12 = arith.constant 1 : index
    %c0_13 = arith.constant 0 : index
    %c0_14 = arith.constant 0 : index
    %11 = vector.load %arg3[%c1_12, %c0_13, %c0_14] : memref<2x195x64xf32, #tpu.memory_space<vmem>>, vector<1x195x64xf32>
    %12 = vector.shape_cast %11 : vector<1x195x64xf32> to vector<195x64xf32>
    %13 = vector.shape_cast %10 : vector<195x64xf32> to vector<1x195x64xf32>
    tpu.vector_store %arg3[%c1_12, %c0_13, %c0_14], %13 {strides = array<i32>} : memref<2x195x64xf32, #tpu.memory_space<vmem>>, vector<1x195x64xf32>,
    return
  }
  func.func @transform_0(%arg0: i32) -> (i32, i32) {
    %c0_i32 = arith.constant 0 : i32
    %c0_i32_0 = arith.constant 0 : i32
    %c0_i32_1 = arith.constant 0 : i32
    return %c0_i32, %c0_i32_0 : i32, i32
  }
  func.func @transform_1(%arg0: i32) -> (i32, i32, i32) {
    %c0_i32 = arith.constant 0 : i32
    %c0_i32_0 = arith.constant 0 : i32
    %c0_i32_1 = arith.constant 0 : i32
    %c0_i32_2 = arith.constant 0 : i32
    return %c0_i32, %c0_i32_0, %c0_i32_1 : i32, i32, i32
  }
  func.func @transform_2(%arg0: i32) -> (i32, i32, i32) {
    %c0_i32 = arith.constant 0 : i32
    %c0_i32_0 = arith.constant 0 : i32
    %c0_i32_1 = arith.constant 0 : i32
    %c0_i32_2 = arith.constant 0 : i32
    return %c0_i32, %c0_i32_0, %c0_i32_1 : i32, i32, i32
  }
}

</mosaic_0001>

<bundles_post_ra>
// kernel: module1566_forward.1
= control target key start
LH: loop header
LB: loop body
LE: loop exit
PB: predicated region body
PF: predicated region fallthrough
CT: control target
= control target key end

     0   :  { %vm942_vm0 = vcmask 523264   ;;  %vm967_vm1 = vcmask 518144   ;;  %s4467_s1 = inlined_call_operand.vmem [shape: f32[2,896,64], index: 1, kind: input, shape index: {}]   ;;  %s4468_s0 = inlined_call_operand.vmem [shape: f32[195,896], index: 0, kind: input, shape index: {}]   ;;  %s4469_s2 = inlined_call_operand.vmem [shape: f32[2,195,64], index: 2, kind: output, shape index: {}]  }
   0x1   :  { %v201_v0 = vld [vmem:[%s4467_s1 + $0x78] sm:$0xff]  ;;  %v200_v2 = vld [vmem:[%s4467_s1 + $0x70] sm:$0xff]  ;;  %v199_v4 = vld [vmem:[%s4467_s1 + $0x68] sm:$0xff] }
   0x2   :  { %v217_v1 = vld [vmem:[%s4467_s1 + $0xf8] sm:$0xff]  ;;  %298 = vmatpush.msra.mxu0 %v201_v0  ;;  %2068 = vmatpush.msra.mxu2 %v201_v0  ;;  %v216_v3 = vld [vmem:[%s4467_s1 + $0xf0] sm:$0xff]  ;;  %v215_v5 = vld [vmem:[%s4467_s1 + $0xe8] sm:$0xff] }
   0x3   :  { %2084 = vmatpush.msra.mxu3 %v217_v1  ;;  %390 = vmatpush.msra.mxu1 %v217_v1  ;;  %v198_v6 = vld [vmem:[%s4467_s1 + $0x60] sm:$0xff]  ;;  %v197_v8 = vld [vmem:[%s4467_s1 + $0x58] sm:$0xff]  ;;  %v196_v10 = vld [vmem:[%s4467_s1 + $0x50] sm:$0xff] }
   0x4   :  { %299 = vmatpush.msra.mxu0 %v200_v2  ;;  %2069 = vmatpush.msra.mxu2 %v200_v2  ;;  %v214_v7 = vld [vmem:[%s4467_s1 + $0xe0] sm:$0xff]  ;;  %v213_v9 = vld [vmem:[%s4467_s1 + $0xd8] sm:$0xff]  ;;  %v212_v11 = vld [vmem:[%s4467_s1 + $0xd0] sm:$0xff] }
   0x5   :  { %2085 = vmatpush.msra.mxu3 %v216_v3  ;;  %391 = vmatpush.msra.mxu1 %v216_v3  ;;  %v195_v12 = vld [vmem:[%s4467_s1 + $0x48] sm:$0xff]  ;;  %v194_v14 = vld [vmem:[%s4467_s1 + $0x40] sm:$0xff]  ;;  %v193_v16 = vld [vmem:[%s4467_s1 + $0x38] sm:$0xff] }
   0x6   :  { %300 = vmatpush.msra.mxu0 %v199_v4  ;;  %2070 = vmatpush.msra.mxu2 %v199_v4  ;;  %v211_v13 = vld [vmem:[%s4467_s1 + $0xc8] sm:$0xff]  ;;  %v210_v15 = vld [vmem:[%s4467_s1 + $0xc0] sm:$0xff]  ;;  %v209_v17 = vld [vmem:[%s4467_s1 + $0xb8] sm:$0xff] }
   0x7   :  { %2086 = vmatpush.msra.mxu3 %v215_v5  ;;  %392 = vmatpush.msra.mxu1 %v215_v5  ;;  %v192_v18 = vld [vmem:[%s4467_s1 + $0x30] sm:$0xff]  ;;  %v191_v20 = vld [vmem:[%s4467_s1 + $0x28] sm:$0xff]  ;;  %v190_v22 = vld [vmem:[%s4467_s1 + $0x20] sm:$0xff] }
   0x8   :  { %301 = vmatpush.msra.mxu0 %v198_v6  ;;  %2071 = vmatpush.msra.mxu2 %v198_v6  ;;  %v208_v19 = vld [vmem:[%s4467_s1 + $0xb0] sm:$0xff]  ;;  %v207_v21 = vld [vmem:[%s4467_s1 + $0xa8] sm:$0xff]  ;;  %v206_v23 = vld [vmem:[%s4467_s1 + $0xa0] sm:$0xff] }
   0x9   :  { %2087 = vmatpush.msra.mxu3 %v214_v7  ;;  %393 = vmatpush.msra.mxu1 %v214_v7  ;;  %v189_v24 = vld [vmem:[%s4467_s1 + $0x18] sm:$0xff]  ;;  %v188_v26 = vld [vmem:[%s4467_s1 + $0x10] sm:$0xff]  ;;  %v187_v28 = vld [vmem:[%s4467_s1 + $0x8] sm:$0xff] }
   0xa   :  { %302 = vmatpush.msra.mxu0 %v197_v8  ;;  %2072 = vmatpush.msra.mxu2 %v197_v8  ;;  %v205_v25 = vld [vmem:[%s4467_s1 + $0x98] sm:$0xff]  ;;  %v204_v27 = vld [vmem:[%s4467_s1 + $0x90] sm:$0xff]  ;;  %v203_v29 = vld [vmem:[%s4467_s1 + $0x88] sm:$0xff] }
   0xb   :  { %2088 = vmatpush.msra.mxu3 %v213_v9  ;;  %394 = vmatpush.msra.mxu1 %v213_v9  ;;  %v186_v30 = vld [vmem:[%s4467_s1] sm:$0xff]  ;;  %v102_v33 = vld [vmem:[%s4468_s0 + $0x2d8] sm:$0xff]  ;;  %v12_v36 = vld [vmem:[%s4468_s0 + $0x8] sm:$0xff] }
   0xc   :  { %303 = vmatpush.msra.mxu0 %v196_v10  ;;  %2073 = vmatpush.msra.mxu2 %v196_v10  ;;  %v202_v31 = vld [vmem:[%s4467_s1 + $0x80] sm:$0xff]  ;;  %v233_v35 = vld [vmem:[%s4467_s1 + $0x178] sm:$0xff]  ;;  %v232_v40 = vld [vmem:[%s4467_s1 + $0x170] sm:$0xff] }
   0xd   :  { %2089 = vmatpush.msra.mxu3 %v212_v11  ;;  %395 = vmatpush.msra.mxu1 %v212_v11  ;;  %v11_v32 = vld [vmem:[%s4468_s0] sm:$0xff]  ;;  %v249_v37 = vld [vmem:[%s4467_s1 + $0x1f8] sm:$0xff]  ;;  %v248_v41 = vld [vmem:[%s4467_s1 + $0x1f0] sm:$0xff] }
   0xe   :  { %304 = vmatpush.msra.mxu0 %v195_v12  ;;  %2074 = vmatpush.msra.mxu2 %v195_v12  ;;  %v103_v34 = vld [vmem:[%s4468_s0 + $0x2e0] sm:$0xff]  ;;  %v265_v38 = vld [vmem:[%s4467_s1 + $0x278] sm:$0xff]  ;;  %v264_v42 = vld [vmem:[%s4467_s1 + $0x270] sm:$0xff] }
   0xf   :  { %2090 = vmatpush.msra.mxu3 %v211_v13  ;;  %396 = vmatpush.msra.mxu1 %v211_v13  ;;  %v281_v39 = vld [vmem:[%s4467_s1 + $0x2f8] sm:$0xff]  ;;  %v280_v43 = vld [vmem:[%s4467_s1 + $0x2f0] sm:$0xff]  ;;  %v231_v44 = vld [vmem:[%s4467_s1 + $0x168] sm:$0xff] }
  0x10   :  { %305 = vmatpush.msra.mxu0 %v194_v14  ;;  %2075 = vmatpush.msra.mxu2 %v194_v14  ;;  %v247_v45 = vld [vmem:[%s4467_s1 + $0x1e8] sm:$0xff]  ;;  %v18_v46 = vld [vmem:[%s4468_s0 + $0x38] sm:$0xff]  ;;  %v109_v48 = vld [vmem:[%s4468_s0 + $0x310] sm:$0xff] }
  0x11   :  { %2091 = vmatpush.msra.mxu3 %v210_v15  ;;  %397 = vmatpush.msra.mxu1 %v210_v15  ;;  %v279_v47 = vld [vmem:[%s4467_s1 + $0x2e8] sm:$0xff]  ;;  %v110_v49 = vld [vmem:[%s4468_s0 + $0x318] sm:$0xff]  ;;  %v230_v51 = vld [vmem:[%s4467_s1 + $0x160] sm:$0xff] }
  0x12   :  { %306 = vmatpush.msra.mxu0 %v193_v16  ;;  %2076 = vmatpush.msra.mxu2 %v193_v16  ;;  %v263_v50 = vld [vmem:[%s4467_s1 + $0x268] sm:$0xff]  ;;  %v19_v52 = vld [vmem:[%s4468_s0 + $0x40] sm:$0xff]  ;;  %v229_v55 = vld [vmem:[%s4467_s1 + $0x158] sm:$0xff] }
  0x13   :  { %2092 = vmatpush.msra.mxu3 %v209_v17  ;;  %398 = vmatpush.msra.mxu1 %v209_v17  ;;  %v246_v53 = vld [vmem:[%s4467_s1 + $0x1e0] sm:$0xff]  ;;  %v245_v57 = vld [vmem:[%s4467_s1 + $0x1d8] sm:$0xff]  ;;  %v228_v59 = vld [vmem:[%s4467_s1 + $0x150] sm:$0xff] }
  0x14   :  { %307 = vmatpush.msra.mxu0 %v192_v18  ;;  %2077 = vmatpush.msra.mxu2 %v192_v18  ;;  %v262_v54 = vld [vmem:[%s4467_s1 + $0x260] sm:$0xff]  ;;  %v261_v58 = vld [vmem:[%s4467_s1 + $0x258] sm:$0xff]  ;;  %v244_v61 = vld [vmem:[%s4467_s1 + $0x1d0] sm:$0xff] }
  0x15   :  { %2093 = vmatpush.msra.mxu3 %v208_v19  ;;  %399 = vmatpush.msra.mxu1 %v208_v19  ;;  %v278_v56 = vld [vmem:[%s4467_s1 + $0x2e0] sm:$0xff]  ;;  %v277_v60 = vld [vmem:[%s4467_s1 + $0x2d8] sm:$0xff]  ;;  %v25_v62 = vld [vmem:[%s4468_s0 + $0x70] sm:$0xff] }
  0x16   :  { %308 = vmatpush.msra.mxu0 %v191_v20  ;;  %2078 = vmatpush.msra.mxu2 %v191_v20  ;;  %v227_v63 = vld [vmem:[%s4467_s1 + $0x148] sm:$0xff]  ;;  %v117_v1 = vld [vmem:[%s4468_s0 + $0x350] sm:$0xff]  ;;  %v26_v4 = vld [vmem:[%s4468_s0 + $0x78] sm:$0xff] }
  0x17   :  { %2094 = vmatpush.msra.mxu3 %v207_v21  ;;  %400 = vmatpush.msra.mxu1 %v207_v21  ;;  %v116_v0 = vld [vmem:[%s4468_s0 + $0x348] sm:$0xff]  ;;  %v260_v2 = vld [vmem:[%s4467_s1 + $0x250] sm:$0xff]  ;;  %v226_v7 = vld [vmem:[%s4467_s1 + $0x140] sm:$0xff] }
  0x18   :  { %309 = vmatpush.msra.mxu0 %v190_v22  ;;  %2079 = vmatpush.msra.mxu2 %v190_v22  ;;  %v276_v3 = vld [vmem:[%s4467_s1 + $0x2d0] sm:$0xff]  ;;  %v243_v5 = vld [vmem:[%s4467_s1 + $0x1c8] sm:$0xff]  ;;  %v242_v9 = vld [vmem:[%s4467_s1 + $0x1c0] sm:$0xff] }
  0x19   :  { %2095 = vmatpush.msra.mxu3 %v206_v23  ;;  %401 = vmatpush.msra.mxu1 %v206_v23  ;;  %v259_v6 = vld [vmem:[%s4467_s1 + $0x248] sm:$0xff]  ;;  %v225_v10 = vld [vmem:[%s4467_s1 + $0x138] sm:$0xff]  ;;  %v258_v11 = vld [vmem:[%s4467_s1 + $0x240] sm:$0xff] }
  0x1a   :  { %310 = vmatpush.msra.mxu0 %v189_v24  ;;  %2080 = vmatpush.msra.mxu2 %v189_v24  ;;  %v275_v8 = vld [vmem:[%s4467_s1 + $0x2c8] sm:$0xff]  ;;  %v241_v12 = vld [vmem:[%s4467_s1 + $0x1b8] sm:$0xff]  ;;  %v274_v13 = vld [vmem:[%s4467_s1 + $0x2c0] sm:$0xff] }
  0x1b   :  { %2096 = vmatpush.msra.mxu3 %v205_v25  ;;  %402 = vmatpush.msra.mxu1 %v205_v25  ;;  %v32_v14 = vld [vmem:[%s4468_s0 + $0xa8] sm:$0xff]  ;;  %v224_v15 = vld [vmem:[%s4467_s1 + $0x130] sm:$0xff]  ;;  %v123_v16 = vld [vmem:[%s4468_s0 + $0x380] sm:$0xff] }
  0x1c   :  { %311 = vmatpush.msra.mxu0 %v188_v26  ;;  %2081 = vmatpush.msra.mxu2 %v188_v26  ;;  %v124_v17 = vld [vmem:[%s4468_s0 + $0x388] sm:$0xff]  ;;  %v257_v18 = vld [vmem:[%s4467_s1 + $0x238] sm:$0xff]  ;;  %v33_v19 = vld [vmem:[%s4468_s0 + $0xb0] sm:$0xff] }
  0x1d   :  { %2097 = vmatpush.msra.mxu3 %v204_v27  ;;  %403 = vmatpush.msra.mxu1 %v204_v27  ;;  %v240_v20 = vld [vmem:[%s4467_s1 + $0x1b0] sm:$0xff]  ;;  %v273_v21 = vld [vmem:[%s4467_s1 + $0x2b8] sm:$0xff]  ;;  %v223_v22 = vld [vmem:[%s4467_s1 + $0x128] sm:$0xff] }
  0x1e   :  { %312 = vmatpush.msra.mxu0 %v187_v28  ;;  %2082 = vmatpush.msra.mxu2 %v187_v28  ;;  %v256_v23 = vld [vmem:[%s4467_s1 + $0x230] sm:$0xff]  ;;  %v239_v24 = vld [vmem:[%s4467_s1 + $0x1a8] sm:$0xff]  ;;  %v39_v26 = vld [vmem:[%s4468_s0 + $0xe0] sm:$0xff] }
  0x1f   :  { %2098 = vmatpush.msra.mxu3 %v203_v29  ;;  %404 = vmatpush.msra.mxu1 %v203_v29  ;;  %v272_v25 = vld [vmem:[%s4467_s1 + $0x2b0] sm:$0xff]  ;;  %v130_v27 = vld [vmem:[%s4468_s0 + $0x3b8] sm:$0xff]  ;;  %v131_v28 = vld [vmem:[%s4468_s0 + $0x3c0] sm:$0xff] }
  0x20   :  { %313 = vmatpush.msra.mxu0 %v186_v30  ;;  %2083 = vmatpush.msra.mxu2 %v186_v30  ;;  %v40_v29 = vld [vmem:[%s4468_s0 + $0xe8] sm:$0xff]  ;;  %v222_v30 = vld [vmem:[%s4467_s1 + $0x120] sm:$0xff] }
  0x21   :  { %2099 = vmatpush.msra.mxu3 %v202_v31  ;;  %314 = vmatmul.f32.vlgmr.msra.gmra.mxu0 %v11_v32  ;;  %v238_v32 = vld [vmem:[%s4467_s1 + $0x1a0] sm:$0xff] }
  0x22   :  { %353 = vmatmul.f32.vlgmr.msra.gmra.mxu2 %v102_v33  ;;  %445 = vmatmul.f32.vlgmr.msra.gmra.mxu3 %v103_v34  ;;  %v271_v33 = vld [vmem:[%s4467_s1 + $0x2a8] sm:$0xff]  ;;  %v46_v34 = vld [vmem:[%s4468_s0 + $0x118] sm:$0xff] }
  0x23   :  { %482 = vmatpush.msrb.mxu2 %v233_v35  ;;  %405 = vmatpush.msra.mxu1 %v202_v31  ;;  %v255_v31 = vld [vmem:[%s4467_s1 + $0x228] sm:$0xff]  ;;  %v137_v35 = vld [vmem:[%s4468_s0 + $0x3f0] sm:$0xff] }
  0x24   :  { %406 = vmatmul.f32.vlgmr.msra.gmra.mxu1 %v12_v36  ;;  %574 = vmatpush.msrb.mxu3 %v249_v37  ;;  %v138_v36 = vld [vmem:[%s4468_s0 + $0x3f8] sm:$0xff]  ;;  %v47_v37 = vld [vmem:[%s4468_s0 + $0x120] sm:$0xff] }
  0x25   :  { %666 = vmatpush.msrb.mxu0 %v265_v38  ;;  %758 = vmatpush.msrb.mxu1 %v281_v39  ;;  %v221_v38 = vld [vmem:[%s4467_s1 + $0x118] sm:$0xff] }
  0x26   :  { %483 = vmatpush.msrb.mxu2 %v232_v40  ;;  %575 = vmatpush.msrb.mxu3 %v248_v41  ;;  %v237_v39 = vld [vmem:[%s4467_s1 + $0x198] sm:$0xff]  ;;  %v254_v40 = vld [vmem:[%s4467_s1 + $0x220] sm:$0xff] }
  0x27   :  { %667 = vmatpush.msrb.mxu0 %v264_v42  ;;  %759 = vmatpush.msrb.mxu1 %v280_v43  ;;  %v270_v41 = vld [vmem:[%s4467_s1 + $0x2a0] sm:$0xff]  ;;  %v220_v42 = vld [vmem:[%s4467_s1 + $0x110] sm:$0xff] }
  0x28   :  { %484 = vmatpush.msrb.mxu2 %v231_v44  ;;  %576 = vmatpush.msrb.mxu3 %v247_v45  ;;  %v53_v43 = vld [vmem:[%s4468_s0 + $0x150] sm:$0xff]  ;;  %v144_v44 = vld [vmem:[%s4468_s0 + $0x428] sm:$0xff] }
  0x29   :  { %317 = vmatmul.f32.gmra.mxu0 %v18_v46  ;;  %760 = vmatpush.msrb.mxu1 %v279_v47  ;;  %v145_v45 = vld [vmem:[%s4468_s0 + $0x430] sm:$0xff]  ;;  %v54_v46 = vld [vmem:[%s4468_s0 + $0x158] sm:$0xff] }
  0x2a   :  { %356 = vmatmul.f32.gmra.mxu2 %v109_v48  ;;  %448 = vmatmul.f32.gmra.mxu3 %v110_v49  ;;  %v236_v47 = vld [vmem:[%s4467_s1 + $0x190] sm:$0xff]  ;;  %v253_v48 = vld [vmem:[%s4467_s1 + $0x218] sm:$0xff] }
  0x2b   :  { %668 = vmatpush.msrb.mxu0 %v263_v50  ;;  %485 = vmatpush.msrb.mxu2 %v230_v51  ;;  %v269_v49 = vld [vmem:[%s4467_s1 + $0x298] sm:$0xff]  ;;  %v219_v50 = vld [vmem:[%s4467_s1 + $0x108] sm:$0xff] }
  0x2c   :  { %409 = vmatmul.f32.gmra.mxu1 %v19_v52  ;;  %577 = vmatpush.msrb.mxu3 %v246_v53  ;;  %v235_v51 = vld [vmem:[%s4467_s1 + $0x188] sm:$0xff]  ;;  %v252_v52 = vld [vmem:[%s4467_s1 + $0x210] sm:$0xff] }
  0x2d   :  { %669 = vmatpush.msrb.mxu0 %v262_v54  ;;  %486 = vmatpush.msrb.mxu2 %v229_v55  ;;  %v60_v53 = vld [vmem:[%s4468_s0 + $0x188] sm:$0xff]  ;;  %v151_v54 = vld [vmem:[%s4468_s0 + $0x460] sm:$0xff] }
  0x2e   :  { %761 = vmatpush.msrb.mxu1 %v278_v56  ;;  %578 = vmatpush.msrb.mxu3 %v245_v57  ;;  %v152_v55 = vld [vmem:[%s4468_s0 + $0x468] sm:$0xff]  ;;  %v61_v56 = vld [vmem:[%s4468_s0 + $0x190] sm:$0xff] }
  0x2f   :  { %670 = vmatpush.msrb.mxu0 %v261_v58  ;;  %487 = vmatpush.msrb.mxu2 %v228_v59  ;;  %v268_v57 = vld [vmem:[%s4467_s1 + $0x290] sm:$0xff]  ;;  %v218_v58 = vld [vmem:[%s4467_s1 + $0x100] sm:$0xff] }
  0x30   :  { %762 = vmatpush.msrb.mxu1 %v277_v60  ;;  %579 = vmatpush.msrb.mxu3 %v244_v61  ;;  %v234_v59 = vld [vmem:[%s4467_s1 + $0x180] sm:$0xff]  ;;  %v251_v60 = vld [vmem:[%s4467_s1 + $0x208] sm:$0xff] }
  0x31   :  { %320 = vmatmul.f32.gmra.mxu0 %v25_v62  ;;  %488 = vmatpush.msrb.mxu2 %v227_v63  ;;  %v267_v61 = vld [vmem:[%s4467_s1 + $0x288] sm:$0xff]  ;;  %v67_v62 = vld [vmem:[%s4468_s0 + $0x1c0] sm:$0xff]  ;;  %v158_v63 = vld [vmem:[%s4468_s0 + $0x498] sm:$0xff] }
  0x32   :  { %359 = vmatmul.f32.gmra.mxu2 %v116_v0  ;;  %451 = vmatmul.f32.gmra.mxu3 %v117_v1  ;;  %v159_v0 = vld [vmem:[%s4468_s0 + $0x4a0] sm:$0xff]  ;;  %v68_v1 = vld [vmem:[%s4468_s0 + $0x1c8] sm:$0xff] }
  0x33   :  { %671 = vmatpush.msrb.mxu0 %v260_v2  ;;  %763 = vmatpush.msrb.mxu1 %v276_v3  ;;  %v297_v2 = vld [vmem:[%s4467_s1 + $0x378] sm:$0xff] }
  0x34   :  { %412 = vmatmul.f32.gmra.mxu1 %v26_v4  ;;  %580 = vmatpush.msrb.mxu3 %v243_v5  ;;  %v1946_v3 = vld [vmem:[%s4467_s1 + $0x3f8] sm:$0xff]  ;;  %v250_v4 = vld [vmem:[%s4467_s1 + $0x200] sm:$0xff] }
  0x35   :  { %672 = vmatpush.msrb.mxu0 %v259_v6  ;;  %489 = vmatpush.msrb.mxu2 %v226_v7  ;;  %v266_v5 = vld [vmem:[%s4467_s1 + $0x280] sm:$0xff]  ;;  %v74_v6 = vld [vmem:[%s4468_s0 + $0x1f8] sm:$0xff]  ;;  %v165_v7 = vld [vmem:[%s4468_s0 + $0x4d0] sm:$0xff] }
  0x36   :  { %764 = vmatpush.msrb.mxu1 %v275_v8  ;;  %581 = vmatpush.msrb.mxu3 %v242_v9  ;;  %v166_v8 = vld [vmem:[%s4468_s0 + $0x4d8] sm:$0xff]  ;;  %v75_v9 = vld [vmem:[%s4468_s0 + $0x200] sm:$0xff] }
  0x37   :  { %490 = vmatpush.msrb.mxu2 %v225_v10  ;;  %673 = vmatpush.msrb.mxu0 %v258_v11  ;;  %v1962_v10 = vld [vmem:[%s4467_s1 + $0x478] sm:$0xff] }
  0x38   :  { %582 = vmatpush.msrb.mxu3 %v241_v12  ;;  %765 = vmatpush.msrb.mxu1 %v274_v13  ;;  %v1978_v11 = vld [vmem:[%s4467_s1 + $0x4f8] sm:$0xff]  ;;  %v296_v12 = vld [vmem:[%s4467_s1 + $0x370] sm:$0xff] }
  0x39   :  { %323 = vmatmul.f32.gmra.mxu0 %v32_v14  ;;  %491 = vmatpush.msrb.mxu2 %v224_v15  ;;  %v1945_v13 = vld [vmem:[%s4467_s1 + $0x3f0] sm:$0xff]  ;;  %v172_v15 = vld [vmem:[%s4468_s0 + $0x508] sm:$0xff] }
  0x3a   :  { %362 = vmatmul.f32.gmra.mxu2 %v123_v16  ;;  %454 = vmatmul.f32.gmra.mxu3 %v124_v17  ;;  %v81_v14 = vld [vmem:[%s4468_s0 + $0x230] sm:$0xff]  ;;  %v82_v17 = vld [vmem:[%s4468_s0 + $0x238] sm:$0xff] }
  0x3b   :  { %674 = vmatpush.msrb.mxu0 %v257_v18  ;;  %583 = vmatpush.msrb.mxu3 %v240_v20  ;;  %v173_v16 = vld [vmem:[%s4468_s0 + $0x510] sm:$0xff]  ;;  %v179_v20 = vld [vmem:[%s4468_s0 + $0x540] sm:$0x7] }
  0x3c   :  { %415 = vmatmul.f32.gmra.mxu1 %v33_v19  ;;  %492 = vmatpush.msrb.mxu2 %v223_v22  ;;  %v1961_v18 = vld [vmem:[%s4467_s1 + $0x470] sm:$0xff]  ;;  %v88_v19 = vld [vmem:[%s4468_s0 + $0x268] sm:$0xff] }
  0x3d   :  { %766 = vmatpush.msrb.mxu1 %v273_v21  ;;  %675 = vmatpush.msrb.mxu0 %v256_v23  ;;  %v180_v21 = vld [vmem:[%s4468_s0 + $0x548] sm:$0x7]  ;;  %v89_v22 = vld [vmem:[%s4468_s0 + $0x270] sm:$0xff] }
  0x3e   :  { %584 = vmatpush.msrb.mxu3 %v239_v24  ;;  %493 = vmatpush.msrb.mxu2 %v222_v30  ;;  %v295_v23 = vld [vmem:[%s4467_s1 + $0x368] sm:$0xff]  ;;  %v1977_v24 = vld [vmem:[%s4467_s1 + $0x4f0] sm:$0xff]  ;;  %v15_v30 = vld [vmem:[%s4468_s0 + $0x20] sm:$0xff] }
  0x3f   :  { %767 = vmatpush.msrb.mxu1 %v272_v25  ;;  %676 = vmatpush.msrb.mxu0 %v255_v31  ;;  %v1944_v25 = vld [vmem:[%s4467_s1 + $0x3e8] sm:$0xff] }
  0x40   :  { %585 = vmatpush.msrb.mxu3 %v238_v32  ;;  %494 = vmatpush.msrb.mxu2 %v221_v38  ;;  %v1960_v31 = vld [vmem:[%s4467_s1 + $0x468] sm:$0xff]  ;;  %v22_v38 = vld [vmem:[%s4468_s0 + $0x58] sm:$0xff] }
  0x41   :  { %326 = vmatmul.f32.gmra.mxu0 %v39_v26  ;;  %768 = vmatpush.msrb.mxu1 %v271_v33  ;;  %v95_v26 = vld [vmem:[%s4468_s0 + $0x2a0] sm:$0xff]  ;;  %v1976_v32 = vld [vmem:[%s4467_s1 + $0x4e8] sm:$0xff] }
  0x42   :  { %365 = vmatmul.f32.gmra.mxu2 %v130_v27  ;;  %457 = vmatmul.f32.gmra.mxu3 %v131_v28  ;;  %v2583_v27 = vld [vmem:[%s4468_s0 + $0x10] sm:$0xff]  ;;  %v14_v28 = vld [vmem:[%s4468_s0 + $0x18] sm:$0xff]  ;;  %v294_v33 = vld [vmem:[%s4467_s1 + $0x360] sm:$0xff] }
  0x43   :  { %586 = vmatpush.msrb.mxu3 %v237_v39  ;;  %677 = vmatpush.msrb.mxu0 %v254_v40  ;;  %v27_v39 = vld [vmem:[%s4468_s0 + $0x80] sm:$0xff]  ;;  %v28_v40 = vld [vmem:[%s4468_s0 + $0x88] sm:$0xff] }
  0x44   :  { %418 = vmatmul.f32.gmra.mxu1 %v40_v29  ;;  %495 = vmatpush.msrb.mxu2 %v220_v42  ;;  %v96_v29 = vld [vmem:[%s4468_s0 + $0x2a8] sm:$0xff]  ;;  %v1959_v42 = vld [vmem:[%s4467_s1 + $0x460] sm:$0xff] }
  0x45   :  { %769 = vmatpush.msrb.mxu1 %v270_v41  ;;  %587 = vmatpush.msrb.mxu3 %v236_v47  ;;  %v23_v41 = vld [vmem:[%s4468_s0 + $0x60] sm:$0xff]  ;;  %v34_v47 = vld [vmem:[%s4468_s0 + $0xb8] sm:$0xff] }
  0x46   :  { %678 = vmatpush.msrb.mxu0 %v253_v48  ;;  %496 = vmatpush.msrb.mxu2 %v219_v50  ;;  %v35_v48 = vld [vmem:[%s4468_s0 + $0xc0] sm:$0xff] }
  0x47   :  { %770 = vmatpush.msrb.mxu1 %v269_v49  ;;  %588 = vmatpush.msrb.mxu3 %v235_v51  ;;  %v30_v49 = vld [vmem:[%s4468_s0 + $0x98] sm:$0xff]  ;;  %v36_v51 = vld [vmem:[%s4468_s0 + $0xc8] sm:$0xff] }
  0x48   :  { %679 = vmatpush.msrb.mxu0 %v252_v52  ;;  %497 = vmatpush.msrb.mxu2 %v218_v58  ;;  %v1958_v52 = vld [vmem:[%s4467_s1 + $0x458] sm:$0xff]  ;;  %v292_v58 = vld [vmem:[%s4467_s1 + $0x350] sm:$0xff] }
  0x49   :  { %329 = vmatmul.f32.gmra.mxu0 %v46_v34  ;;  %771 = vmatpush.msrb.mxu1 %v268_v57  ;;  %v20_v34 = vld [vmem:[%s4468_s0 + $0x48] sm:$0xff]  ;;  %v37_v57 = vld [vmem:[%s4468_s0 + $0xd0] sm:$0xff] }
  0x4a   :  { %368 = vmatmul.f32.gmra.mxu2 %v137_v35  ;;  %460 = vmatmul.f32.gmra.mxu3 %v138_v36  ;;  %v21_v35 = vld [vmem:[%s4468_s0 + $0x50] sm:$0xff]  ;;  %v16_v36 = vld [vmem:[%s4468_s0 + $0x28] sm:$0xff] }
  0x4b   :  { %589 = vmatpush.msrb.mxu3 %v234_v59  ;;  %680 = vmatpush.msrb.mxu0 %v251_v60  ;;  %v1941_v59 = vld [vmem:[%s4467_s1 + $0x3d0] sm:$0xff] }
  0x4c   :  { %421 = vmatmul.f32.gmra.mxu1 %v47_v37  ;;  %850 = vmatpush.msra.mxu2 %v297_v2  ;;  %v1943_v37 = vld [vmem:[%s4467_s1 + $0x3e0] sm:$0xff]  ;;  %v49_v2 = vld [vmem:[%s4468_s0 + $0x130] sm:$0xff] }
  0x4d   :  { %772 = vmatpush.msrb.mxu1 %v267_v61  ;;  %1257 = vmatpush.msra.mxu3 %v1946_v3 }
  0x4e   :  { %681 = vmatpush.msrb.mxu0 %v250_v4  ;;  %851 = vmatpush.msra.mxu2 %v296_v12  ;;  %v44_v4 = vld [vmem:[%s4468_s0 + $0x108] sm:$0xff]  ;;  %v1973_v12 = vld [vmem:[%s4467_s1 + $0x4d0] sm:$0xff] }
  0x4f   :  { %773 = vmatpush.msrb.mxu1 %v266_v5  ;;  %1258 = vmatpush.msra.mxu3 %v1945_v13  ;;  %v1957_v5 = vld [vmem:[%s4467_s1 + $0x450] sm:$0xff]  ;;  %v1940_v13 = vld [vmem:[%s4467_s1 + $0x3c8] sm:$0xff] }
  0x50   :  { %1349 = vmatpush.msra.mxu0 %v1962_v10  ;;  %852 = vmatpush.msra.mxu2 %v295_v23  ;;  %v1956_v23 = vld [vmem:[%s4467_s1 + $0x448] sm:$0xff] }
  0x51   :  { %332 = vmatmul.f32.gmra.mxu0 %v53_v43  ;;  %1441 = vmatpush.msra.mxu1 %v1978_v11  ;;  %v293_v43 = vld [vmem:[%s4467_s1 + $0x358] sm:$0xff]  ;;  %v291_v11 = vld [vmem:[%s4467_s1 + $0x348] sm:$0xff] }
  0x52   :  { %371 = vmatmul.f32.gmra.mxu2 %v144_v44  ;;  %463 = vmatmul.f32.gmra.mxu3 %v145_v45  ;;  %v1975_v44 = vld [vmem:[%s4467_s1 + $0x4e0] sm:$0xff]  ;;  %v29_v45 = vld [vmem:[%s4468_s0 + $0x90] sm:$0xff] }
  0x53   :  { %1350 = vmatpush.msra.mxu0 %v1961_v18  ;;  %1442 = vmatpush.msra.mxu1 %v1977_v24  ;;  %v62_v24 = vld [vmem:[%s4468_s0 + $0x198] sm:$0xff] }
  0x54   :  { %424 = vmatmul.f32.gmra.mxu1 %v54_v46  ;;  %1259 = vmatpush.msra.mxu3 %v1944_v25  ;;  %v1942_v46 = vld [vmem:[%s4467_s1 + $0x3d8] sm:$0xff]  ;;  %v63_v25 = vld [vmem:[%s4468_s0 + $0x1a0] sm:$0xff] }
  0x55   :  { %1351 = vmatpush.msra.mxu0 %v1960_v31  ;;  %1443 = vmatpush.msra.mxu1 %v1976_v32  ;;  %v1939_v31 = vld [vmem:[%s4467_s1 + $0x3c0] sm:$0xff] }
  0x56   :  { %853 = vmatpush.msra.mxu2 %v294_v33  ;;  %1260 = vmatpush.msra.mxu3 %v1943_v37  ;;  %v69_v37 = vld [vmem:[%s4468_s0 + $0x1d0] sm:$0xff] }
  0x57   :  { %1352 = vmatpush.msra.mxu0 %v1959_v42  ;;  %1444 = vmatpush.msra.mxu1 %v1975_v44  ;;  %v71_v44 = vld [vmem:[%s4468_s0 + $0x1e0] sm:$0xff] }
  0x58   :  { %854 = vmatpush.msra.mxu2 %v293_v43  ;;  %1261 = vmatpush.msra.mxu3 %v1942_v46 }
  0x59   :  { %335 = vmatmul.f32.gmra.mxu0 %v60_v53  ;;  %v1974_v53 = vld [vmem:[%s4467_s1 + $0x4d8] sm:$0xff] }
  0x5a   :  { %374 = vmatmul.f32.gmra.mxu2 %v151_v54  ;;  %466 = vmatmul.f32.gmra.mxu3 %v152_v55  ;;  %v41_v54 = vld [vmem:[%s4468_s0 + $0xf0] sm:$0xff]  ;;  %v42_v55 = vld [vmem:[%s4468_s0 + $0xf8] sm:$0xff] }
  0x5b   :  { %1353 = vmatpush.msra.mxu0 %v1958_v52  ;;  %1445 = vmatpush.msra.mxu1 %v1974_v53  ;;  %v77_v52 = vld [vmem:[%s4468_s0 + $0x210] sm:$0xff] }
  0x5c   :  { %427 = vmatmul.f32.gmra.mxu1 %v61_v56  ;;  %855 = vmatpush.msra.mxu2 %v292_v58 }
  0x5d   :  { %1262 = vmatpush.msra.mxu3 %v1941_v59  ;;  %1354 = vmatpush.msra.mxu0 %v1957_v5  ;;  %v1970_v5 = vld [vmem:[%s4467_s1 + $0x4b8] sm:$0xff] }
  0x5e   :  { %856 = vmatpush.msra.mxu2 %v291_v11  ;;  %1446 = vmatpush.msra.mxu1 %v1973_v12 }
  0x5f   :  { %1263 = vmatpush.msra.mxu3 %v1940_v13  ;;  %1355 = vmatpush.msra.mxu0 %v1956_v23  ;;  %v85_v13 = vld [vmem:[%s4468_s0 + $0x250] sm:$0xff] }
  0x61   :  { %338 = vmatmul.f32.gmra.mxu0 %v67_v62  ;;  %1264 = vmatpush.msra.mxu3 %v1939_v31  ;;  %v1969_v31 = vld [vmem:[%s4467_s1 + $0x4b0] sm:$0xff] }
  0x62   :  { %377 = vmatmul.f32.gmra.mxu2 %v158_v63  ;;  %469 = vmatmul.f32.gmra.mxu3 %v159_v0  ;;  %v43_v0 = vld [vmem:[%s4468_s0 + $0x100] sm:$0xff] }
  0x64   :  { %430 = vmatmul.f32.gmra.mxu1 %v68_v1  ;;  %v48_v1 = vld [vmem:[%s4468_s0 + $0x128] sm:$0xff] }
  0x69   :  { %341 = vmatmul.f32.gmra.mxu0 %v74_v6 }
  0x6a   :  { %380 = vmatmul.f32.gmra.mxu2 %v165_v7  ;;  %472 = vmatmul.f32.gmra.mxu3 %v166_v8  ;;  %v50_v8 = vld [vmem:[%s4468_s0 + $0x138] sm:$0xff] }
  0x6c   :  { %433 = vmatmul.f32.gmra.mxu1 %v75_v9 }
  0x71   :  { %344 = vmatmul.f32.gmra.mxu0 %v81_v14  ;;  %v55_v14 = vld [vmem:[%s4468_s0 + $0x160] sm:$0xff] }
  0x72   :  { %383 = vmatmul.f32.gmra.mxu2 %v172_v15  ;;  %475 = vmatmul.f32.gmra.mxu3 %v173_v16  ;;  %v56_v15 = vld [vmem:[%s4468_s0 + $0x168] sm:$0xff] }
  0x74   :  { %436 = vmatmul.f32.gmra.mxu1 %v82_v17  ;;  %v51_v17 = vld [vmem:[%s4468_s0 + $0x140] sm:$0xff] }
  0x79   :  { %347 = vmatmul.f32.gmra.mxu0 %v88_v19 }
  0x7a   :  { %386 = vmatmul.f32.gmra.mxu2 %v179_v20  ;;  %478 = vmatmul.f32.gmra.mxu3 %v180_v21 }
  0x7c   :  { %439 = vmatmul.f32.gmra.mxu1 %v89_v22  ;;  %v57_v22 = vld [vmem:[%s4468_s0 + $0x170] sm:$0xff] }
  0x81   :  { %350 = vmatmul.f32.gmra.mxu0 %v95_v26 }
  0x82   :  { %498 = vmatmul.f32.vlgmr.msrb.gmra.mxu2 %v2583_v27  ;;  %590 = vmatmul.f32.vlgmr.msrb.gmra.mxu3 %v14_v28  ;;  %v58_v28 = vld [vmem:[%s4468_s0 + $0x178] sm:$0xff] }
  0x84   :  { %442 = vmatmul.f32.gmra.mxu1 %v96_v29  ;;  %v1972_v29 = vld [vmem:[%s4467_s1 + $0x4c8] sm:$0xff] }
  0x85   :  { %1447 = vmatpush.msra.mxu1 %v1972_v29  ;;  %v1953_v29 = vld [vmem:[%s4467_s1 + $0x430] sm:$0xff] }
  0x89   :  { %682 = vmatmul.f32.vlgmr.msrb.gmra.mxu0 %v15_v30  ;;  %v290_v30 = vld [vmem:[%s4467_s1 + $0x340] sm:$0xff] }
  0x8a   :  { %501 = vmatmul.f32.gmra.mxu2 %v20_v34  ;;  %593 = vmatmul.f32.gmra.mxu3 %v21_v35 }
  0x8b   :  { %857 = vmatpush.msra.mxu2 %v290_v30  ;;  %v287_v30 = vld [vmem:[%s4467_s1 + $0x328] sm:$0xff] }
  0x8c   :  { %774 = vmatmul.f32.vlgmr.msrb.gmra.mxu1 %v16_v36  ;;  %v64_v36 = vld [vmem:[%s4468_s0 + $0x1a8] sm:$0xff] }
  0x91   :  { %685 = vmatmul.f32.gmra.mxu0 %v22_v38  ;;  %v70_v38 = vld [vmem:[%s4468_s0 + $0x1d8] sm:$0xff] }
  0x92   :  { %504 = vmatmul.f32.gmra.mxu2 %v27_v39  ;;  %596 = vmatmul.f32.gmra.mxu3 %v28_v40  ;;  %v65_v40 = vld [vmem:[%s4468_s0 + $0x1b0] sm:$0xff] }
  0x94   :  { %777 = vmatmul.f32.gmra.mxu1 %v23_v41  ;;  %v1955_v41 = vld [vmem:[%s4467_s1 + $0x440] sm:$0xff] }
  0x95   :  { %1356 = vmatpush.msra.mxu0 %v1955_v41 }
  0x99   :  { %688 = vmatmul.f32.gmra.mxu0 %v29_v45 }
  0x9a   :  { %507 = vmatmul.f32.gmra.mxu2 %v34_v47  ;;  %599 = vmatmul.f32.gmra.mxu3 %v35_v48  ;;  %v289_v47 = vld [vmem:[%s4467_s1 + $0x338] sm:$0xff]  ;;  %v1971_v48 = vld [vmem:[%s4467_s1 + $0x4c0] sm:$0xff] }
  0x9b   :  { %858 = vmatpush.msra.mxu2 %v289_v47  ;;  %1448 = vmatpush.msra.mxu1 %v1971_v48  ;;  %v104_v47 = vld [vmem:[%s4468_s0 + $0x2e8] sm:$0xff]  ;;  %v105_v48 = vld [vmem:[%s4468_s0 + $0x2f0] sm:$0xff] }
  0x9c   :  { %780 = vmatmul.f32.gmra.mxu1 %v30_v49  ;;  %v1938_v49 = vld [vmem:[%s4467_s1 + $0x3b8] sm:$0xff] }
  0x9d   :  { %1265 = vmatpush.msra.mxu3 %v1938_v49  ;;  %1449 = vmatpush.msra.mxu1 %v1970_v5  ;;  %v111_v5 = vld [vmem:[%s4468_s0 + $0x320] sm:$0xff] }
  0x9e   :  { %v2652_v50 = vpop.f32.mrf.mxu0 }
  0x9f   :  { %1450 = vmatpush.msra.mxu1 %v1969_v31  ;;  %v285_v31 = vld [vmem:[%s4467_s1 + $0x318] sm:$0xff] }
  0xa1   :  { %v2669_v56 = vpop.f32.mrf.mxu1  ;;  %691 = vmatmul.f32.gmra.mxu0 %v36_v51  ;;  %v76_v51 = vld [vmem:[%s4468_s0 + $0x208] sm:$0xff] }
  0xa2   :  { %510 = vmatmul.f32.gmra.mxu2 %v41_v54  ;;  %602 = vmatmul.f32.gmra.mxu3 %v42_v55  ;;  %v72_v54 = vld [vmem:[%s4468_s0 + $0x1e8] sm:$0xff] }
  0xa4   :  { %783 = vmatmul.f32.gmra.mxu1 %v37_v57 }
  0xa5   :  { %v354_v60 = vpop.f32.mrf.mxu2  ;;  %v446_v61 = vpop.f32.mrf.mxu3 }
  0xa6   :  { %v2680_v62 = vadd.f32 %v446_v61, %v354_v60  ;;  %v2682_v63 = vpop.f32.mrf.mxu0  ;;  %v78_v60 = vld [vmem:[%s4468_s0 + $0x218] sm:$0xff] }
  0xa7   :  { %v1954_v61 = vld [vmem:[%s4467_s1 + $0x438] sm:$0xff] }
  0xa8   :  { %1357 = vmatpush.msra.mxu0 %v1954_v61 }
  0xa9   :  { %v2693_v3 = vpop.f32.mrf.mxu1  ;;  %694 = vmatmul.f32.gmra.mxu0 %v43_v0  ;;  %v83_v0 = vld [vmem:[%s4468_s0 + $0x240] sm:$0xff] }
  0xaa   :  { %513 = vmatmul.f32.gmra.mxu2 %v48_v1  ;;  %605 = vmatmul.f32.gmra.mxu3 %v49_v2  ;;  %v84_v1 = vld [vmem:[%s4468_s0 + $0x248] sm:$0xff] }
  0xab   :  { %1358 = vmatpush.msra.mxu0 %v1953_v29 }
  0xac   :  { %786 = vmatmul.f32.gmra.mxu1 %v44_v4  ;;  %v79_v4 = vld [vmem:[%s4468_s0 + $0x220] sm:$0xff] }
  0xad   :  { %v357_v6 = vpop.f32.mrf.mxu2  ;;  %v449_v7 = vpop.f32.mrf.mxu3 }
  0xae   :  { %v2704_v9 = vadd.f32 %v449_v7, %v357_v6  ;;  %v2706_v10 = vpop.f32.mrf.mxu0  ;;  %v288_v6 = vld [vmem:[%s4467_s1 + $0x330] sm:$0xff] }
  0xaf   :  { %859 = vmatpush.msra.mxu2 %v288_v6  ;;  %v112_v6 = vld [vmem:[%s4468_s0 + $0x328] sm:$0xff] }
  0xb1   :  { %v2723_v16 = vpop.f32.mrf.mxu1  ;;  %697 = vmatmul.f32.gmra.mxu0 %v50_v8  ;;  %860 = vmatpush.msra.mxu2 %v287_v30  ;;  %v114_v30 = vld [vmem:[%s4468_s0 + $0x338] sm:$0xff] }
  0xb2   :  { %516 = vmatmul.f32.gmra.mxu2 %v55_v14  ;;  %608 = vmatmul.f32.gmra.mxu3 %v56_v15  ;;  %v1937_v14 = vld [vmem:[%s4467_s1 + $0x3b0] sm:$0xff]  ;;  %v90_v15 = vld [vmem:[%s4468_s0 + $0x278] sm:$0xff] }
  0xb3   :  { %1266 = vmatpush.msra.mxu3 %v1937_v14 }
  0xb4   :  { %789 = vmatmul.f32.gmra.mxu1 %v51_v17  ;;  %v91_v17 = vld [vmem:[%s4468_s0 + $0x280] sm:$0xff] }
  0xb5   :  { %v360_v18 = vpop.f32.mrf.mxu2  ;;  %v452_v19 = vpop.f32.mrf.mxu3 }
  0xb6   :  { %v2728_v20 = vadd.f32 %v452_v19, %v360_v18  ;;  %v2730_v21 = vpop.f32.mrf.mxu0  ;;  %v86_v19 = vld [vmem:[%s4468_s0 + $0x258] sm:$0xff] }
  0xb9   :  { %v2744_v26 = vpop.f32.mrf.mxu1  ;;  %700 = vmatmul.f32.gmra.mxu0 %v57_v22 }
  0xba   :  { %519 = vmatmul.f32.gmra.mxu2 %v62_v24  ;;  %611 = vmatmul.f32.gmra.mxu3 %v63_v25  ;;  %v92_v24 = vld [vmem:[%s4468_s0 + $0x288] sm:$0xff] }
  0xbc   :  { %792 = vmatmul.f32.gmra.mxu1 %v58_v28 }
  0xbd   :  { %v363_v32 = vpop.f32.mrf.mxu2  ;;  %v455_v33 = vpop.f32.mrf.mxu3 }
  0xbe   :  { %v2758_v34 = vadd.f32 %v455_v33, %v363_v32  ;;  %v2760_v35 = vpop.f32.mrf.mxu0  ;;  %v97_v32 = vld [vmem:[%s4468_s0 + $0x2b0] sm:$0xff]  ;;  %v98_v33 = vld [vmem:[%s4468_s0 + $0x2b8] sm:$0xff] }
  0xc1   :  { %v2771_v39 = vpop.f32.mrf.mxu1  ;;  %703 = vmatmul.f32.gmra.mxu0 %v64_v36 }
  0xc2   :  { %522 = vmatmul.f32.gmra.mxu2 %v69_v37  ;;  %614 = vmatmul.f32.gmra.mxu3 %v70_v38  ;;  %v93_v37 = vld [vmem:[%s4468_s0 + $0x290] sm:$0xff]  ;;  %v1936_v38 = vld [vmem:[%s4467_s1 + $0x3a8] sm:$0xff] }
  0xc3   :  { %1267 = vmatpush.msra.mxu3 %v1936_v38 }
  0xc4   :  { %795 = vmatmul.f32.gmra.mxu1 %v65_v40 }
  0xc5   :  { %v366_v42 = vpop.f32.mrf.mxu2  ;;  %v458_v43 = vpop.f32.mrf.mxu3 }
  0xc6   :  { %v2782_v45 = vadd.f32 %v458_v43, %v366_v42  ;;  %v2784_v46 = vpop.f32.mrf.mxu0 }
  0xc9   :  { %v2801_v53 = vpop.f32.mrf.mxu1  ;;  %706 = vmatmul.f32.gmra.mxu0 %v71_v44  ;;  %v99_v44 = vld [vmem:[%s4468_s0 + $0x2c0] sm:$0xff] }
  0xca   :  { %525 = vmatmul.f32.gmra.mxu2 %v76_v51  ;;  %617 = vmatmul.f32.gmra.mxu3 %v77_v52  ;;  %v100_v51 = vld [vmem:[%s4468_s0 + $0x2c8] sm:$0xff] }
  0xcb   :  { %v1952_v52 = vld [vmem:[%s4467_s1 + $0x428] sm:$0xff] }
  0xcc   :  { %798 = vmatmul.f32.gmra.mxu1 %v72_v54  ;;  %v1968_v54 = vld [vmem:[%s4467_s1 + $0x4a8] sm:$0xff]  ;;  %1359 = vmatpush.msra.mxu0 %v1952_v52  ;;  %v121_v52 = vld [vmem:[%s4468_s0 + $0x370] sm:$0xff] }
  0xcd   :  { %v369_v55 = vpop.f32.mrf.mxu2  ;;  %v461_v57 = vpop.f32.mrf.mxu3  ;;  %1451 = vmatpush.msra.mxu1 %v1968_v54  ;;  %v408_v54 = vadd.f32 %v2669_v56, %v2652_v50  ;;  %v284_v50 = vld [vmem:[%s4467_s1 + $0x310] sm:$0xff]  ;;  %v132_v56 = vld [vmem:[%s4468_s0 + $0x3c8] sm:$0xff] }
  0xce   :  { %v2806_v58 = vadd.f32 %v461_v57, %v369_v55  ;;  %v2808_v59 = vpop.f32.mrf.mxu0  ;;  %v286_v55 = vld [vmem:[%s4467_s1 + $0x320] sm:$0xff] }
  0xcf   :  { %861 = vmatpush.msra.mxu2 %v286_v55  ;;  %v1950_v55 = vld [vmem:[%s4467_s1 + $0x418] sm:$0xff] }
  0xd1   :  { %v2822_v2 = vpop.f32.mrf.mxu1  ;;  %709 = vmatmul.f32.gmra.mxu0 %v78_v60  ;;  %862 = vmatpush.msra.mxu2 %v285_v31 }
  0xd2   :  { %528 = vmatmul.f32.gmra.mxu2 %v83_v0  ;;  %620 = vmatmul.f32.gmra.mxu3 %v84_v1  ;;  %v106_v1 = vld [vmem:[%s4468_s0 + $0x2f8] sm:$0xff] }
  0xd3   :  { %863 = vmatpush.msra.mxu2 %v284_v50  ;;  %v141_v50 = vld [vmem:[%s4468_s0 + $0x410] sm:$0xff] }
  0xd4   :  { %801 = vmatmul.f32.gmra.mxu1 %v79_v4  ;;  %v1935_v4 = vld [vmem:[%s4467_s1 + $0x3a0] sm:$0xff] }
  0xd5   :  { %v372_v7 = vpop.f32.mrf.mxu2  ;;  %v464_v8 = vpop.f32.mrf.mxu3  ;;  %1268 = vmatpush.msra.mxu3 %v1935_v4 }
  0xd6   :  { %v2833_v11 = vadd.f32 %v464_v8, %v372_v7  ;;  %v2835_v12 = vpop.f32.mrf.mxu0  ;;  %v107_v8 = vld [vmem:[%s4468_s0 + $0x300] sm:$0xff] }
  0xd9   :  { %v2849_v18 = vpop.f32.mrf.mxu1  ;;  %712 = vmatmul.f32.gmra.mxu0 %v85_v13 }
  0xda   :  { %531 = vmatmul.f32.gmra.mxu2 %v90_v15  ;;  %623 = vmatmul.f32.gmra.mxu3 %v91_v17 }
  0xdc   :  { %804 = vmatmul.f32.gmra.mxu1 %v86_v19  ;;  %v113_v19 = vld [vmem:[%s4468_s0 + $0x330] sm:$0xff] }
  0xdd   :  { %v375_v22 = vpop.f32.mrf.mxu2  ;;  %v467_v23 = vpop.f32.mrf.mxu3 }
  0xde   :  { %v2857_v25 = vadd.f32 %v467_v23, %v375_v22  ;;  %v2859_v28 = vpop.f32.mrf.mxu0  ;;  %v1951_v22 = vld [vmem:[%s4467_s1 + $0x420] sm:$0xff]  ;;  %v118_v23 = vld [vmem:[%s4468_s0 + $0x358] sm:$0xff] }
  0xdf   :  { %1360 = vmatpush.msra.mxu0 %v1951_v22 }
  0xe1   :  { %v2876_v36 = vpop.f32.mrf.mxu1  ;;  %715 = vmatmul.f32.gmra.mxu0 %v92_v24  ;;  %v119_v24 = vld [vmem:[%s4468_s0 + $0x360] sm:$0xff] }
  0xe2   :  { %534 = vmatmul.f32.gmra.mxu2 %v97_v32  ;;  %626 = vmatmul.f32.gmra.mxu3 %v98_v33  ;;  %v1967_v32 = vld [vmem:[%s4467_s1 + $0x4a0] sm:$0xff]  ;;  %v1934_v33 = vld [vmem:[%s4467_s1 + $0x398] sm:$0xff] }
  0xe3   :  { %1452 = vmatpush.msra.mxu1 %v1967_v32  ;;  %1269 = vmatpush.msra.mxu3 %v1934_v33 }
  0xe4   :  { %807 = vmatmul.f32.gmra.mxu1 %v93_v37  ;;  %1361 = vmatpush.msra.mxu0 %v1950_v55  ;;  %v414_v55 = vadd.f32 %v2723_v16, %v2706_v10 }
  0xe5   :  { %v378_v40 = vpop.f32.mrf.mxu2  ;;  %v470_v41 = vpop.f32.mrf.mxu3 }
  0xe6   :  { %v2884_v42 = vadd.f32 %v470_v41, %v378_v40  ;;  %v2886_v43 = vpop.f32.mrf.mxu0 }
  0xe9   :  { %v2897_v49 = vpop.f32.mrf.mxu1  ;;  %718 = vmatmul.f32.gmra.mxu0 %v99_v44  ;;  %v120_v44 = vld [vmem:[%s4468_s0 + $0x368] sm:$0xff] }
  0xea   :  { %537 = vmatmul.f32.gmra.mxu2 %v104_v47  ;;  %629 = vmatmul.f32.gmra.mxu3 %v105_v48  ;;  %v125_v47 = vld [vmem:[%s4468_s0 + $0x390] sm:$0xff]  ;;  %v126_v48 = vld [vmem:[%s4468_s0 + $0x398] sm:$0xff] }
  0xec   :  { %810 = vmatmul.f32.gmra.mxu1 %v100_v51 }
  0xed   :  { %v381_v57 = vpop.f32.mrf.mxu2  ;;  %v473_v60 = vpop.f32.mrf.mxu3 }
  0xee   :  { %v2911_v61 = vadd.f32 %v473_v60, %v381_v57  ;;  %v2913_v0 = vpop.f32.mrf.mxu0  ;;  %v1966_v57 = vld [vmem:[%s4467_s1 + $0x498] sm:$0xff] }
  0xef   :  { %1453 = vmatpush.msra.mxu1 %v1966_v57 }
  0xf1   :  { %v2927_v7 = vpop.f32.mrf.mxu1  ;;  %721 = vmatmul.f32.gmra.mxu0 %v106_v1 }
  0xf2   :  { %540 = vmatmul.f32.gmra.mxu2 %v111_v5  ;;  %632 = vmatmul.f32.gmra.mxu3 %v112_v6  ;;  %v127_v6 = vld [vmem:[%s4468_s0 + $0x3a0] sm:$0xff] }
  0xf4   :  { %813 = vmatmul.f32.gmra.mxu1 %v107_v8  ;;  %v133_v8 = vld [vmem:[%s4468_s0 + $0x3d0] sm:$0xff] }
  0xf5   :  { %v384_v13 = vpop.f32.mrf.mxu2  ;;  %v476_v14 = vpop.f32.mrf.mxu3 }
  0xf6   :  { %v2932_v15 = vadd.f32 %v476_v14, %v384_v13  ;;  %v2934_v17 = vpop.f32.mrf.mxu0 }
  0xf9   :  { %v2948_v29 = vpop.f32.mrf.mxu1  ;;  %724 = vmatmul.f32.gmra.mxu0 %v113_v19  ;;  %v128_v19 = vld [vmem:[%s4468_s0 + $0x3a8] sm:$0xff] }
  0xfa   :  { %543 = vmatmul.f32.gmra.mxu2 %v118_v23  ;;  %635 = vmatmul.f32.gmra.mxu3 %v119_v24  ;;  %v1933_v23 = vld [vmem:[%s4467_s1 + $0x390] sm:$0xff]  ;;  %v411_v24 = vadd.f32 %v2693_v3, %v2682_v63 }
  0xfb   :  { %1270 = vmatpush.msra.mxu3 %v1933_v23  ;;  %v417_v23 = vadd.f32 %v2744_v26, %v2730_v21  ;;  %v1964_v21 = vld [vmem:[%s4467_s1 + $0x488] sm:$0xff]  ;;  %v282_v26 = vld [vmem:[%s4467_s1 + $0x300] sm:$0xff] }
  0xfc   :  { %816 = vmatmul.f32.gmra.mxu1 %v114_v30 }
  0xfd   :  { %v387_v37 = vpop.f32.mrf.mxu2  ;;  %v479_v38 = vpop.f32.mrf.mxu3 }
  0xfe   :  { %v2962_v40 = vadd.f32 %v479_v38, %v387_v37  ;;  %v2964_v41 = vpop.f32.mrf.mxu0  ;;  %v134_v38 = vld [vmem:[%s4468_s0 + $0x3d8] sm:$0xff] }
 0x101   :  { %v2975_v51 = vpop.f32.mrf.mxu1  ;;  %727 = vmatmul.f32.gmra.mxu0 %v120_v44  ;;  %v139_v44 = vld [vmem:[%s4468_s0 + $0x400] sm:$0xff] }
 0x102   :  { %546 = vmatmul.f32.gmra.mxu2 %v125_v47  ;;  %638 = vmatmul.f32.gmra.mxu3 %v126_v48  ;;  %v140_v47 = vld [vmem:[%s4468_s0 + $0x408] sm:$0xff]  ;;  %v135_v48 = vld [vmem:[%s4468_s0 + $0x3e0] sm:$0xff] }
 0x104   :  { %819 = vmatmul.f32.gmra.mxu1 %v121_v52 }
 0x105   :  { %v499_v60 = vpop.f32.mrf.mxu2  ;;  %v591_v1 = vpop.f32.mrf.mxu3 }
 0x106   :  { %v500_v4 = vadd.f32 %v499_v60, %v408_v54  ;;  %v683_v5 = vpop.f32.mrf.mxu0  ;;  %v1949_v54 = vld [vmem:[%s4467_s1 + $0x410] sm:$0xff]  ;;  %v283_v60 = vld [vmem:[%s4467_s1 + $0x308] sm:$0xff] }
 0x107   :  { %1362 = vmatpush.msra.mxu0 %v1949_v54  ;;  %864 = vmatpush.msra.mxu2 %v283_v60  ;;  %v420_v60 = vadd.f32 %v2771_v39, %v2760_v35 }
 0x108   :  { %v592_v13 = vadd.f32 %v591_v1, %v500_v4  ;;  %v1965_v1 = vld [vmem:[%s4467_s1 + $0x490] sm:$0xff]  ;;  %v1932_v4 = vld [vmem:[%s4467_s1 + $0x388] sm:$0xff] }
 0x109   :  { %v775_v14 = vpop.f32.mrf.mxu1  ;;  %730 = vmatmul.f32.gmra.mxu0 %v127_v6  ;;  %1454 = vmatpush.msra.mxu1 %v1965_v1 }
 0x10a   :  { %v684_v22 = vadd.f32 %v683_v5, %v592_v13  ;;  %549 = vmatmul.f32.gmra.mxu2 %v132_v56  ;;  %641 = vmatmul.f32.gmra.mxu3 %v133_v8  ;;  %v146_v56 = vld [vmem:[%s4468_s0 + $0x438] sm:$0xff]  ;;  %v147_v8 = vld [vmem:[%s4468_s0 + $0x440] sm:$0xff] }
 0x10b   :  { %1271 = vmatpush.msra.mxu3 %v1932_v4  ;;  %1455 = vmatpush.msra.mxu1 %v1964_v21  ;;  %v168_v21 = vld [vmem:[%s4468_s0 + $0x4e8] sm:$0xff] }
 0x10c   :  { %v3008_v30 = vadd.f32 %v775_v14, %v684_v22  ;;  %822 = vmatmul.f32.gmra.mxu1 %v128_v19  ;;  %v142_v19 = vld [vmem:[%s4468_s0 + $0x418] sm:$0xff]  ;;  %865 = vmatpush.msra.mxu2 %v282_v26 }
 0x10d   :  { %v502_v31 = vpop.f32.mrf.mxu2  ;;  %v594_v32 = vpop.f32.mrf.mxu3 }
 0x10e   :  { %v503_v33 = vadd.f32 %v502_v31, %v411_v24  ;;  %v686_v37 = vpop.f32.mrf.mxu0  ;;  %v1948_v31 = vld [vmem:[%s4467_s1 + $0x408] sm:$0xff] }
 0x10f   :  { %1363 = vmatpush.msra.mxu0 %v1948_v31  ;;  %v1994_v31 = vld [vmem:[%s4467_s1 + $0x578] sm:$0xff] }
 0x110   :  { %v595_v63 = vadd.f32 %v594_v32, %v503_v33  ;;  %1533 = vmatpush.msrb.mxu2 %v1994_v31 }
 0x111   :  { %v778_v3 = vpop.f32.mrf.mxu1  ;;  %733 = vmatmul.f32.gmra.mxu0 %v134_v38 }
 0x112   :  { %v687_v52 = vadd.f32 %v686_v37, %v595_v63  ;;  %552 = vmatmul.f32.gmra.mxu2 %v139_v44  ;;  %644 = vmatmul.f32.gmra.mxu3 %v140_v47  ;;  %v148_v44 = vld [vmem:[%s4468_s0 + $0x448] sm:$0xff]  ;;  %v153_v47 = vld [vmem:[%s4468_s0 + $0x470] sm:$0xff]  ;;  %v154_v63 = vld [vmem:[%s4468_s0 + $0x478] sm:$0xff] }
 0x114   :  { %v3027_v57 = vadd.f32 %v778_v3, %v687_v52  ;;  %825 = vmatmul.f32.gmra.mxu1 %v135_v48  ;;  %v149_v52 = vld [vmem:[%s4468_s0 + $0x450] sm:$0xff] }
 0x115   :  { %v505_v5 = vpop.f32.mrf.mxu2  ;;  %v597_v6 = vpop.f32.mrf.mxu3 }
 0x116   :  { %v506_v10 = vadd.f32 %v505_v5, %v414_v55  ;;  %v689_v16 = vpop.f32.mrf.mxu0  ;;  %v1931_v55 = vld [vmem:[%s4467_s1 + $0x380] sm:$0xff] }
 0x117   :  { %1272 = vmatpush.msra.mxu3 %v1931_v55 }
 0x118   :  { %v598_v13 = vadd.f32 %v597_v6, %v506_v10 }
 0x119   :  { %v781_v14 = vpop.f32.mrf.mxu1  ;;  %736 = vmatmul.f32.gmra.mxu0 %v141_v50  ;;  %v160_v50 = vld [vmem:[%s4468_s0 + $0x4a8] sm:$0xff] }
 0x11a   :  { %v690_v22 = vadd.f32 %v689_v16, %v598_v13  ;;  %555 = vmatmul.f32.gmra.mxu2 %v146_v56  ;;  %647 = vmatmul.f32.gmra.mxu3 %v147_v8  ;;  %v155_v16 = vld [vmem:[%s4468_s0 + $0x480] sm:$0xff]  ;;  %v161_v56 = vld [vmem:[%s4468_s0 + $0x4b0] sm:$0xff]  ;;  %v156_v8 = vld [vmem:[%s4468_s0 + $0x488] sm:$0xff] }
 0x11c   :  { %v3052_v24 = vadd.f32 %v781_v14, %v690_v22  ;;  %828 = vmatmul.f32.gmra.mxu1 %v142_v19  ;;  %v1947_v14 = vld [vmem:[%s4467_s1 + $0x400] sm:$0xff]  ;;  %v423_v19 = vadd.f32 %v2801_v53, %v2784_v46 }
 0x11d   :  { %v508_v32 = vpop.f32.mrf.mxu2  ;;  %v600_v33 = vpop.f32.mrf.mxu3  ;;  %1364 = vmatpush.msra.mxu0 %v1947_v14  ;;  %v2009_v14 = vld [vmem:[%s4467_s1 + $0x5f0] sm:$0xff] }
 0x11e   :  { %v509_v37 = vadd.f32 %v508_v32, %v417_v23  ;;  %v692_v38 = vpop.f32.mrf.mxu0  ;;  %v1963_v23 = vld [vmem:[%s4467_s1 + $0x480] sm:$0xff]  ;;  %v2010_v32 = vld [vmem:[%s4467_s1 + $0x5f8] sm:$0xff] }
 0x11f   :  { %1456 = vmatpush.msra.mxu1 %v1963_v23  ;;  %1625 = vmatpush.msrb.mxu3 %v2010_v32 }
 0x120   :  { %v601_v3 = vadd.f32 %v600_v33, %v509_v37 }
 0x121   :  { %v784_v48 = vpop.f32.mrf.mxu1  ;;  %739 = vmatmul.f32.gmra.mxu0 %v148_v44  ;;  %v167_v44 = vld [vmem:[%s4468_s0 + $0x4e0] sm:$0xff]  ;;  %1626 = vmatpush.msrb.mxu3 %v2009_v14  ;;  %v2024_v14 = vld [vmem:[%s4467_s1 + $0x668] sm:$0xff] }
 0x122   :  { %v693_v54 = vadd.f32 %v692_v38, %v601_v3  ;;  %558 = vmatmul.f32.gmra.mxu2 %v153_v47  ;;  %650 = vmatmul.f32.gmra.mxu3 %v154_v63  ;;  %v162_v38 = vld [vmem:[%s4468_s0 + $0x4b8] sm:$0xff]  ;;  %v163_v63 = vld [vmem:[%s4468_s0 + $0x4c0] sm:$0xff] }
 0x124   :  { %v3080_v1 = vadd.f32 %v784_v48, %v693_v54  ;;  %831 = vmatmul.f32.gmra.mxu1 %v149_v52  ;;  %v426_v48 = vadd.f32 %v2822_v2, %v2808_v59  ;;  %v2026_v54 = vld [vmem:[%s4467_s1 + $0x678] sm:$0xff] }
 0x125   :  { %v511_v4 = vpop.f32.mrf.mxu2  ;;  %v603_v5 = vpop.f32.mrf.mxu3  ;;  %1717 = vmatpush.msrb.mxu0 %v2026_v54  ;;  %v2042_v59 = vld [vmem:[%s4467_s1 + $0x6f8] sm:$0xff]  ;;  %v183_v54 = vld [vmem:[%s4468_s0 + $0x560] sm:$0x7] }
 0x126   :  { %v512_v6 = vadd.f32 %v511_v4, %v420_v60  ;;  %v695_v10 = vpop.f32.mrf.mxu0  ;;  %v174_v2 = vld [vmem:[%s4468_s0 + $0x518] sm:$0xff]  ;;  %1809 = vmatpush.msrb.mxu1 %v2042_v59  ;;  %v184_v59 = vld [vmem:[%s4468_s0 + $0x568] sm:$0x7] }
 0x128   :  { %v604_v35 = vadd.f32 %v603_v5, %v512_v6  ;;  %v169_v6 = vld [vmem:[%s4468_s0 + $0x4f0] sm:$0xff] }
 0x129   :  { %v787_v39 = vpop.f32.mrf.mxu1  ;;  %742 = vmatmul.f32.gmra.mxu0 %v155_v16 }
 0x12a   :  { %v696_v13 = vadd.f32 %v695_v10, %v604_v35  ;;  %561 = vmatmul.f32.gmra.mxu2 %v160_v50  ;;  %653 = vmatmul.f32.gmra.mxu3 %v161_v56  ;;  %v175_v10 = vld [vmem:[%s4468_s0 + $0x520] sm:$0xff]  ;;  %v170_v56 = vld [vmem:[%s4468_s0 + $0x4f8] sm:$0xff] }
 0x12c   :  { %v3099_v22 = vadd.f32 %v787_v39, %v696_v13  ;;  %834 = vmatmul.f32.gmra.mxu1 %v156_v8  ;;  %v1993_v39 = vld [vmem:[%s4467_s1 + $0x570] sm:$0xff]  ;;  %v429_v8 = vadd.f32 %v2849_v18, %v2835_v12  ;;  %v182_v18 = vld [vmem:[%s4468_s0 + $0x558] sm:$0x7] }
 0x12d   :  { %v514_v33 = vpop.f32.mrf.mxu2  ;;  %v606_v37 = vpop.f32.mrf.mxu3  ;;  %1534 = vmatpush.msrb.mxu2 %v1993_v39  ;;  %v181_v12 = vld [vmem:[%s4468_s0 + $0x550] sm:$0x7] }
 0x12e   :  { %v515_v46 = vadd.f32 %v514_v33, %v423_v19  ;;  %v698_v53 = vpop.f32.mrf.mxu0  ;;  %v176_v33 = vld [vmem:[%s4468_s0 + $0x528] sm:$0xff] }
 0x130   :  { %v607_v26 = vadd.f32 %v606_v37, %v515_v46 }
 0x131   :  { %v790_v47 = vpop.f32.mrf.mxu1  ;;  %745 = vmatmul.f32.gmra.mxu0 %v162_v38 }
 0x132   :  { %v699_v3 = vadd.f32 %v698_v53, %v607_v26  ;;  %564 = vmatmul.f32.gmra.mxu2 %v167_v44  ;;  %656 = vmatmul.f32.gmra.mxu3 %v168_v21  ;;  %v177_v53 = vld [vmem:[%s4468_s0 + $0x530] sm:$0xff]  ;;  %v432_v44 = vadd.f32 %v2876_v36, %v2859_v28 }
 0x133   :  { %v2025_v26 = vld [vmem:[%s4467_s1 + $0x670] sm:$0xff] }
 0x134   :  { %v3124_v52 = vadd.f32 %v790_v47, %v699_v3  ;;  %837 = vmatmul.f32.gmra.mxu1 %v163_v63  ;;  %v1992_v47 = vld [vmem:[%s4467_s1 + $0x568] sm:$0xff]  ;;  %v2041_v63 = vld [vmem:[%s4467_s1 + $0x6f0] sm:$0xff]  ;;  %1718 = vmatpush.msrb.mxu0 %v2025_v26  ;;  %v977_v26 = vld [vmem:[%s4468_s0 + $0x40] sm:$0xff] }
 0x135   :  { %v517_v55 = vpop.f32.mrf.mxu2  ;;  %v609_v60 = vpop.f32.mrf.mxu3  ;;  %1535 = vmatpush.msrb.mxu2 %v1992_v47  ;;  %1810 = vmatpush.msrb.mxu1 %v2041_v63  ;;  %v978_v63 = vld [vmem:[%s4468_s0 + $0x48] sm:$0xff] }
 0x136   :  { %v518_v4 = vadd.f32 %v517_v55, %v426_v48  ;;  %v701_v5 = vpop.f32.mrf.mxu0  ;;  %v2008_v55 = vld [vmem:[%s4467_s1 + $0x5e8] sm:$0xff]  ;;  %1719 = vmatpush.msrb.mxu0 %v2024_v14 }
 0x137   :  { %1627 = vmatpush.msrb.mxu3 %v2008_v55  ;;  %v2039_v55 = vld [vmem:[%s4467_s1 + $0x6e0] sm:$0xff] }
 0x138   :  { %v610_v16 = vadd.f32 %v609_v60, %v518_v4  ;;  %v17_v60 = vld [vmem:[%s4468_s0 + $0x30] sm:$0xff]  ;;  %v969_v4 = vld [vmem:[%s4468_s0] sm:$0xff] }
 0x139   :  { %v793_v50 = vpop.f32.mrf.mxu1  ;;  %748 = vmatmul.f32.gmra.mxu0 %v169_v6 }
 0x13a   :  { %v702_v35 = vadd.f32 %v701_v5, %v610_v16  ;;  %567 = vmatmul.f32.gmra.mxu2 %v174_v2  ;;  %659 = vmatmul.f32.gmra.mxu3 %v175_v10  ;;  %v435_v10 = vadd.f32 %v2897_v49, %v2886_v43  ;;  %v976_v43 = vld [vmem:[%s4468_s0 + $0x38] sm:$0xff] }
 0x13c   :  { %v3149_v13 = vadd.f32 %v793_v50, %v702_v35  ;;  %840 = vmatmul.f32.gmra.mxu1 %v170_v56 }
 0x13d   :  { %v520_v19 = vpop.f32.mrf.mxu2  ;;  %v612_v23 = vpop.f32.mrf.mxu3 }
 0x13e   :  { %v521_v31 = vadd.f32 %v520_v19, %v429_v8  ;;  %v704_v32 = vpop.f32.mrf.mxu0  ;;  %v970_v8 = vld [vmem:[%s4468_s0 + $0x8] sm:$0xff] }
 0x13f   :  { %v24_v19 = vld [vmem:[%s4468_s0 + $0x68] sm:$0xff] }
 0x140   :  { %v613_v37 = vadd.f32 %v612_v23, %v521_v31 }
 0x141   :  { %v796_v46 = vpop.f32.mrf.mxu1  ;;  %751 = vmatmul.f32.gmra.mxu0 %v176_v33  ;;  %v1991_v33 = vld [vmem:[%s4467_s1 + $0x560] sm:$0xff] }
 0x142   :  { %v705_v38 = vadd.f32 %v704_v32, %v613_v37  ;;  %570 = vmatmul.f32.gmra.mxu2 %v181_v12  ;;  %662 = vmatmul.f32.gmra.mxu3 %v182_v18  ;;  %v2040_v32 = vld [vmem:[%s4467_s1 + $0x6e8] sm:$0xff]  ;;  %v438_v12 = vadd.f32 %v2927_v7, %v2913_v0  ;;  %v2007_v37 = vld [vmem:[%s4467_s1 + $0x5e0] sm:$0xff] }
 0x143   :  { %1811 = vmatpush.msrb.mxu1 %v2040_v32  ;;  %1536 = vmatpush.msrb.mxu2 %v1991_v33  ;;  %v31_v0 = vld [vmem:[%s4468_s0 + $0xa0] sm:$0xff]  ;;  %v45_v32 = vld [vmem:[%s4468_s0 + $0x110] sm:$0xff] }
 0x144   :  { %v3168_v21 = vadd.f32 %v796_v46, %v705_v38  ;;  %843 = vmatmul.f32.gmra.mxu1 %v177_v53  ;;  %1628 = vmatpush.msrb.mxu3 %v2007_v37 }
 0x145   :  { %v523_v3 = vpop.f32.mrf.mxu2  ;;  %v615_v48 = vpop.f32.mrf.mxu3  ;;  %1812 = vmatpush.msrb.mxu1 %v2039_v55 }
 0x146   :  { %v524_v28 = vadd.f32 %v523_v3, %v432_v44  ;;  %v707_v36 = vpop.f32.mrf.mxu0 }
 0x148   :  { %v616_v5 = vadd.f32 %v615_v48, %v524_v28  ;;  %v441_v48 = vadd.f32 %v2948_v29, %v2934_v17 }
 0x149   :  { %v799_v6 = vpop.f32.mrf.mxu1  ;;  %754 = vmatmul.f32.gmra.mxu0 %v183_v54  ;;  %v1990_v54 = vld [vmem:[%s4467_s1 + $0x558] sm:$0xff] }
 0x14a   :  { %v708_v2 = vadd.f32 %v707_v36, %v616_v5  ;;  %866 = vmatmul.f32.vlgmr.msra.gmra.mxu2 %v17_v60  ;;  %1273 = vmatmul.f32.vlgmr.msra.gmra.mxu3 %v969_v4  ;;  %v2023_v36 = vld [vmem:[%s4467_s1 + $0x660] sm:$0xff]  ;;  %v984_v5 = vld [vmem:[%s4468_s0 + $0x78] sm:$0xff] }
 0x14b   :  { %1720 = vmatpush.msrb.mxu0 %v2023_v36  ;;  %1537 = vmatpush.msrb.mxu2 %v1990_v54 }
 0x14c   :  { %v3196_v16 = vadd.f32 %v799_v6, %v708_v2  ;;  %846 = vmatmul.f32.gmra.mxu1 %v184_v59  ;;  %v2006_v6 = vld [vmem:[%s4467_s1 + $0x5d8] sm:$0xff]  ;;  %v990_v2 = vld [vmem:[%s4468_s0 + $0xa8] sm:$0xff] }
 0x14d   :  { %v526_v50 = vpop.f32.mrf.mxu2  ;;  %v618_v56 = vpop.f32.mrf.mxu3  ;;  %v38_v59 = vld [vmem:[%s4468_s0 + $0xd8] sm:$0xff]  ;;  %1629 = vmatpush.msrb.mxu3 %v2006_v6  ;;  %v1005_v6 = vld [vmem:[%s4468_s0 + $0x120] sm:$0xff] }
 0x14e   :  { %v527_v35 = vadd.f32 %v526_v50, %v435_v10  ;;  %v710_v39 = vpop.f32.mrf.mxu0 }
 0x150   :  { %v619_v49 = vadd.f32 %v618_v56, %v527_v35  ;;  %v985_v56 = vld [vmem:[%s4468_s0 + $0x80] sm:$0xff] }
 0x151   :  { %v802_v23 = vpop.f32.mrf.mxu1  ;;  %1365 = vmatmul.f32.vlgmr.msra.gmra.mxu0 %v970_v8 }
 0x152   :  { %v711_v31 = vadd.f32 %v710_v39, %v619_v49  ;;  %869 = vmatmul.f32.gmra.mxu2 %v24_v19  ;;  %1276 = vmatmul.f32.gmra.mxu3 %v976_v43  ;;  %v444_v39 = vadd.f32 %v2975_v51, %v2964_v41  ;;  %v997_v41 = vld [vmem:[%s4468_s0 + $0xe0] sm:$0xff] }
 0x154   :  { %v3218_v18 = vadd.f32 %v802_v23, %v711_v31  ;;  %1457 = vmatmul.f32.vlgmr.msra.gmra.mxu1 %v2583_v27  ;;  %v983_v27 = vld [vmem:[%s4468_s0 + $0x70] sm:$0xff]  ;;  %v2022_v31 = vld [vmem:[%s4467_s1 + $0x658] sm:$0xff] }
 0x155   :  { %v529_v46 = vpop.f32.mrf.mxu2  ;;  %v621_v53 = vpop.f32.mrf.mxu3  ;;  %v991_v23 = vld [vmem:[%s4468_s0 + $0xb0] sm:$0xff]  ;;  %1721 = vmatpush.msrb.mxu0 %v2022_v31 }
 0x156   :  { %v530_v38 = vadd.f32 %v529_v46, %v438_v12  ;;  %v713_v44 = vpop.f32.mrf.mxu0  ;;  %v992_v12 = vld [vmem:[%s4468_s0 + $0xb8] sm:$0xff] }
 0x157   :  { %v2038_v46 = vld [vmem:[%s4467_s1 + $0x6d8] sm:$0xff] }
 0x158   :  { %v622_v7 = vadd.f32 %v621_v53, %v530_v38  ;;  %1813 = vmatpush.msrb.mxu1 %v2038_v46  ;;  %v1989_v38 = vld [vmem:[%s4467_s1 + $0x550] sm:$0xff]  ;;  %v2020_v46 = vld [vmem:[%s4467_s1 + $0x648] sm:$0xff] }
 0x159   :  { %v805_v47 = vpop.f32.mrf.mxu1  ;;  %1368 = vmatmul.f32.gmra.mxu0 %v977_v26  ;;  %1538 = vmatpush.msrb.mxu2 %v1989_v38 }
 0x15a   :  { %v714_v3 = vadd.f32 %v713_v44, %v622_v7  ;;  %872 = vmatmul.f32.gmra.mxu2 %v31_v0  ;;  %1279 = vmatmul.f32.gmra.mxu3 %v983_v27  ;;  %v2005_v44 = vld [vmem:[%s4467_s1 + $0x5d0] sm:$0xff] }
 0x15b   :  { %1630 = vmatpush.msrb.mxu3 %v2005_v44  ;;  %v2036_v44 = vld [vmem:[%s4467_s1 + $0x6c8] sm:$0xff] }
 0x15c   :  { %v3238_v28 = vadd.f32 %v805_v47, %v714_v3  ;;  %1460 = vmatmul.f32.gmra.mxu1 %v978_v63  ;;  %v998_v47 = vld [vmem:[%s4468_s0 + $0xe8] sm:$0xff]  ;;  %v1004_v3 = vld [vmem:[%s4468_s0 + $0x118] sm:$0xff] }
 0x15d   :  { %v532_v60 = vpop.f32.mrf.mxu2  ;;  %v624_v4 = vpop.f32.mrf.mxu3  ;;  %v52_v63 = vld [vmem:[%s4468_s0 + $0x148] sm:$0xff] }
 0x15e   :  { %v533_v17 = vadd.f32 %v532_v60, %v441_v48  ;;  %v716_v29 = vpop.f32.mrf.mxu0  ;;  %v2021_v60 = vld [vmem:[%s4467_s1 + $0x650] sm:$0xff] }
 0x15f   :  { %1722 = vmatpush.msrb.mxu0 %v2021_v60 }
 0x160   :  { %v625_v10 = vadd.f32 %v624_v4, %v533_v17 }
 0x161   :  { %v808_v50 = vpop.f32.mrf.mxu1  ;;  %1371 = vmatmul.f32.gmra.mxu0 %v984_v5 }
 0x162   :  { %v717_v35 = vadd.f32 %v716_v29, %v625_v10  ;;  %875 = vmatmul.f32.gmra.mxu2 %v38_v59  ;;  %1282 = vmatmul.f32.gmra.mxu3 %v990_v2  ;;  %v1988_v59 = vld [vmem:[%s4467_s1 + $0x548] sm:$0xff]  ;;  %v2037_v2 = vld [vmem:[%s4467_s1 + $0x6d0] sm:$0xff]  ;;  %v59_v10 = vld [vmem:[%s4468_s0 + $0x180] sm:$0xff] }
 0x163   :  { %1539 = vmatpush.msrb.mxu2 %v1988_v59  ;;  %1814 = vmatpush.msrb.mxu1 %v2037_v2  ;;  %v1026_v2 = vld [vmem:[%s4468_s0 + $0x1c8] sm:$0xff] }
 0x164   :  { %v3266_v8 = vadd.f32 %v808_v50, %v717_v35  ;;  %1463 = vmatmul.f32.gmra.mxu1 %v985_v56  ;;  %v1006_v35 = vld [vmem:[%s4468_s0 + $0x128] sm:$0xff]  ;;  %1723 = vmatpush.msrb.mxu0 %v2020_v46 }
 0x165   :  { %v535_v14 = vpop.f32.mrf.mxu2  ;;  %v627_v19 = vpop.f32.mrf.mxu3  ;;  %1815 = vmatpush.msrb.mxu1 %v2036_v44  ;;  %v2018_v44 = vld [vmem:[%s4467_s1 + $0x638] sm:$0xff] }
 0x166   :  { %v536_v43 = vadd.f32 %v535_v14, %v444_v39  ;;  %v719_v49 = vpop.f32.mrf.mxu0  ;;  %v2004_v14 = vld [vmem:[%s4467_s1 + $0x5c8] sm:$0xff] }
 0x167   :  { %1631 = vmatpush.msrb.mxu3 %v2004_v14 }
 0x168   :  { %v628_v51 = vadd.f32 %v627_v19, %v536_v43 }
 0x169   :  { %v811_v33 = vpop.f32.mrf.mxu1  ;;  %1374 = vmatmul.f32.gmra.mxu0 %v991_v23 }
 0x16a   :  { %v720_v37 = vadd.f32 %v719_v49, %v628_v51  ;;  %878 = vmatmul.f32.gmra.mxu2 %v45_v32  ;;  %1285 = vmatmul.f32.gmra.mxu3 %v997_v41  ;;  %v1012_v32 = vld [vmem:[%s4468_s0 + $0x158] sm:$0xff]  ;;  %v1018_v51 = vld [vmem:[%s4468_s0 + $0x188] sm:$0xff] }
 0x16b   :  { %v66_v41 = vld [vmem:[%s4468_s0 + $0x1b8] sm:$0xff] }
 0x16c   :  { %v3286_v53 = vadd.f32 %v811_v33, %v720_v37  ;;  %1466 = vmatmul.f32.gmra.mxu1 %v992_v12 }
 0x16d   :  { %v538_v26 = vpop.f32.mrf.mxu2  ;;  %v630_v0 = vpop.f32.mrf.mxu3 }
 0x16e   :  { %v539_v27 = vadd.f32 %v538_v26, %v2680_v62  ;;  %v722_v7 = vpop.f32.mrf.mxu0  ;;  %v999_v62 = vld [vmem:[%s4468_s0 + $0xf0] sm:$0xff]  ;;  %v1987_v26 = vld [vmem:[%s4467_s1 + $0x540] sm:$0xff] }
 0x16f   :  { %1540 = vmatpush.msrb.mxu2 %v1987_v26 }
 0x170   :  { %v631_v48 = vadd.f32 %v630_v0, %v539_v27  ;;  %v2003_v0 = vld [vmem:[%s4467_s1 + $0x5c0] sm:$0xff] }
 0x171   :  { %v814_v36 = vpop.f32.mrf.mxu1  ;;  %1377 = vmatmul.f32.gmra.mxu0 %v998_v47  ;;  %1632 = vmatpush.msrb.mxu3 %v2003_v0  ;;  %v2034_v0 = vld [vmem:[%s4467_s1 + $0x6b8] sm:$0xff] }
 0x172   :  { %v723_v54 = vadd.f32 %v722_v7, %v631_v48  ;;  %881 = vmatmul.f32.gmra.mxu2 %v52_v63  ;;  %1288 = vmatmul.f32.gmra.mxu3 %v1004_v3  ;;  %v1019_v3 = vld [vmem:[%s4468_s0 + $0x190] sm:$0xff] }
 0x173   :  { %v73_v48 = vld [vmem:[%s4468_s0 + $0x1f0] sm:$0xff] }
 0x174   :  { %v3307_v55 = vadd.f32 %v814_v36, %v723_v54  ;;  %1469 = vmatmul.f32.gmra.mxu1 %v999_v62  ;;  %v1025_v36 = vld [vmem:[%s4468_s0 + $0x1c0] sm:$0xff] }
 0x175   :  { %v541_v4 = vpop.f32.mrf.mxu2  ;;  %v633_v17 = vpop.f32.mrf.mxu3 }
 0x176   :  { %v542_v29 = vadd.f32 %v541_v4, %v2704_v9  ;;  %v725_v5 = vpop.f32.mrf.mxu0  ;;  %v1011_v9 = vld [vmem:[%s4468_s0 + $0x150] sm:$0xff] }
 0x178   :  { %v634_v50 = vadd.f32 %v633_v17, %v542_v29  ;;  %v2019_v17 = vld [vmem:[%s4467_s1 + $0x640] sm:$0xff] }
 0x179   :  { %v817_v56 = vpop.f32.mrf.mxu1  ;;  %1380 = vmatmul.f32.gmra.mxu0 %v1005_v6 }
 0x17a   :  { %v726_v39 = vadd.f32 %v725_v5, %v634_v50  ;;  %884 = vmatmul.f32.gmra.mxu2 %v59_v10  ;;  %1291 = vmatmul.f32.gmra.mxu3 %v1011_v9  ;;  %v1986_v10 = vld [vmem:[%s4467_s1 + $0x538] sm:$0xff]  ;;  %v2035_v9 = vld [vmem:[%s4467_s1 + $0x6c0] sm:$0xff]  ;;  %v3394_v50 = vld [vmem:[%s4468_s0 + $0x228] sm:$0xff] }
 0x17b   :  { %1724 = vmatpush.msrb.mxu0 %v2019_v17  ;;  %1541 = vmatpush.msrb.mxu2 %v1986_v10  ;;  %v1047_v10 = vld [vmem:[%s4468_s0 + $0x270] sm:$0xff] }
 0x17c   :  { %v3334_v19 = vadd.f32 %v817_v56, %v726_v39  ;;  %1472 = vmatmul.f32.gmra.mxu1 %v1006_v35  ;;  %v1027_v39 = vld [vmem:[%s4468_s0 + $0x1d0] sm:$0xff] }
 0x17d   :  { %v544_v43 = vpop.f32.mrf.mxu2  ;;  %v636_v49 = vpop.f32.mrf.mxu3  ;;  %1816 = vmatpush.msrb.mxu1 %v2035_v9  ;;  %1725 = vmatpush.msrb.mxu0 %v2018_v44  ;;  %v2017_v9 = vld [vmem:[%s4467_s1 + $0x630] sm:$0xff] }
 0x17e   :  { %v545_v23 = vadd.f32 %v544_v43, %v2728_v20  ;;  %v728_v31 = vpop.f32.mrf.mxu0  ;;  %v1013_v20 = vld [vmem:[%s4468_s0 + $0x160] sm:$0xff]  ;;  %v2002_v43 = vld [vmem:[%s4467_s1 + $0x5b8] sm:$0xff] }
 0x17f   :  { %1633 = vmatpush.msrb.mxu3 %v2002_v43  ;;  %1817 = vmatpush.msrb.mxu1 %v2034_v0  ;;  %v1984_v43 = vld [vmem:[%s4467_s1 + $0x528] sm:$0xff] }
 0x180   :  { %v637_v33 = vadd.f32 %v636_v49, %v545_v23  ;;  %1726 = vmatpush.msrb.mxu0 %v2017_v9 }
 0x181   :  { %v820_v12 = vpop.f32.mrf.mxu1  ;;  %1383 = vmatmul.f32.gmra.mxu0 %v1012_v32 }
 0x182   :  { %v729_v37 = vadd.f32 %v728_v31, %v637_v33  ;;  %887 = vmatmul.f32.gmra.mxu2 %v66_v41  ;;  %1294 = vmatmul.f32.gmra.mxu3 %v1018_v51  ;;  %v1033_v51 = vld [vmem:[%s4468_s0 + $0x200] sm:$0xff] }
 0x183   :  { %v3415_v33 = vld [vmem:[%s4468_s0 + $0x260] sm:$0xff] }
 0x184   :  { %v3352_v38 = vadd.f32 %v820_v12, %v729_v37  ;;  %1475 = vmatmul.f32.gmra.mxu1 %v1013_v20  ;;  %v1039_v12 = vld [vmem:[%s4468_s0 + $0x230] sm:$0xff] }
 0x185   :  { %v547_v27 = vpop.f32.mrf.mxu2  ;;  %v639_v7 = vpop.f32.mrf.mxu3 }
 0x186   :  { %v548_v47 = vadd.f32 %v547_v27, %v2758_v34  ;;  %v731_v63 = vpop.f32.mrf.mxu0  ;;  %v1020_v34 = vld [vmem:[%s4468_s0 + $0x198] sm:$0xff]  ;;  %v1985_v27 = vld [vmem:[%s4467_s1 + $0x530] sm:$0xff] }
 0x187   :  { %1542 = vmatpush.msrb.mxu2 %v1985_v27 }
 0x188   :  { %v640_v62 = vadd.f32 %v639_v7, %v548_v47 }
 0x189   :  { %v823_v54 = vpop.f32.mrf.mxu1  ;;  %1386 = vmatmul.f32.gmra.mxu0 %v1019_v3  ;;  %1543 = vmatpush.msrb.mxu2 %v1984_v43  ;;  %v1074_v43 = vld [vmem:[%s4468_s0 + $0x348] sm:$0xff] }
 0x18a   :  { %v732_v60 = vadd.f32 %v731_v63, %v640_v62  ;;  %890 = vmatmul.f32.gmra.mxu2 %v73_v48  ;;  %1297 = vmatmul.f32.gmra.mxu3 %v1025_v36  ;;  %v1040_v48 = vld [vmem:[%s4468_s0 + $0x238] sm:$0xff]  ;;  %v2001_v36 = vld [vmem:[%s4467_s1 + $0x5b0] sm:$0xff] }
 0x18b   :  { %v3445_v62 = vld [vmem:[%s4468_s0 + $0x298] sm:$0xff]  ;;  %1634 = vmatpush.msrb.mxu3 %v2001_v36 }
 0x18c   :  { %v3376_v4 = vadd.f32 %v823_v54, %v732_v60  ;;  %1478 = vmatmul.f32.gmra.mxu1 %v1020_v34  ;;  %v1046_v54 = vld [vmem:[%s4468_s0 + $0x268] sm:$0xff]  ;;  %v1041_v60 = vld [vmem:[%s4468_s0 + $0x240] sm:$0xff] }
 0x18d   :  { %v550_v29 = vpop.f32.mrf.mxu2  ;;  %v642_v5 = vpop.f32.mrf.mxu3 }
 0x18e   :  { %v551_v6 = vadd.f32 %v550_v29, %v2782_v45  ;;  %v734_v59 = vpop.f32.mrf.mxu0  ;;  %v1032_v45 = vld [vmem:[%s4468_s0 + $0x1f8] sm:$0xff] }
 0x190   :  { %v643_v56 = vadd.f32 %v642_v5, %v551_v6 }
 0x191   :  { %v826_v35 = vpop.f32.mrf.mxu1  ;;  %1389 = vmatmul.f32.gmra.mxu0 %v1026_v2 }
 0x192   :  { %v735_v14 = vadd.f32 %v734_v59, %v643_v56  ;;  %893 = vmatmul.f32.gmra.mxu2 %v3394_v50  ;;  %1300 = vmatmul.f32.gmra.mxu3 %v1032_v45  ;;  %v3466_v45 = vld [vmem:[%s4468_s0 + $0x2d0] sm:$0xff]  ;;  %v1053_v56 = vld [vmem:[%s4468_s0 + $0x2a0] sm:$0xff] }
 0x194   :  { %v3406_v49 = vadd.f32 %v826_v35, %v735_v14  ;;  %1481 = vmatmul.f32.gmra.mxu1 %v1027_v39  ;;  %v1048_v39 = vld [vmem:[%s4468_s0 + $0x278] sm:$0xff] }
 0x195   :  { %v553_v23 = vpop.f32.mrf.mxu2  ;;  %v645_v31 = vpop.f32.mrf.mxu3 }
 0x196   :  { %v554_v32 = vadd.f32 %v553_v23, %v2806_v58  ;;  %v737_v41 = vpop.f32.mrf.mxu0  ;;  %v1034_v58 = vld [vmem:[%s4468_s0 + $0x208] sm:$0xff]  ;;  %v2033_v23 = vld [vmem:[%s4467_s1 + $0x6b0] sm:$0xff] }
 0x197   :  { %1818 = vmatpush.msrb.mxu1 %v2033_v23 }
 0x198   :  { %v646_v20 = vadd.f32 %v645_v31, %v554_v32  ;;  %v2000_v32 = vld [vmem:[%s4467_s1 + $0x5a8] sm:$0xff] }
 0x199   :  { %v829_v37 = vpop.f32.mrf.mxu1  ;;  %1392 = vmatmul.f32.gmra.mxu0 %v1033_v51  ;;  %1635 = vmatpush.msrb.mxu3 %v2000_v32  ;;  %v2015_v32 = vld [vmem:[%s4467_s1 + $0x620] sm:$0xff] }
 0x19a   :  { %v738_v46 = vadd.f32 %v737_v41, %v646_v20  ;;  %896 = vmatmul.f32.gmra.mxu2 %v3415_v33  ;;  %1303 = vmatmul.f32.gmra.mxu3 %v1039_v12 }
 0x19c   :  { %v3427_v26 = vadd.f32 %v829_v37, %v738_v46  ;;  %1484 = vmatmul.f32.gmra.mxu1 %v1034_v58  ;;  %v1054_v37 = vld [vmem:[%s4468_s0 + $0x2a8] sm:$0xff]  ;;  %v1060_v46 = vld [vmem:[%s4468_s0 + $0x2d8] sm:$0xff] }
 0x19d   :  { %v556_v7 = vpop.f32.mrf.mxu2  ;;  %v648_v47 = vpop.f32.mrf.mxu3  ;;  %v3493_v58 = vld [vmem:[%s4468_s0 + $0x308] sm:$0xff] }
 0x19e   :  { %v557_v63 = vadd.f32 %v556_v7, %v2833_v11  ;;  %v740_v3 = vpop.f32.mrf.mxu0  ;;  %v2016_v7 = vld [vmem:[%s4467_s1 + $0x628] sm:$0xff] }
 0x19f   :  { %1727 = vmatpush.msrb.mxu0 %v2016_v7  ;;  %v1075_v7 = vld [vmem:[%s4468_s0 + $0x350] sm:$0xff] }
 0x1a0   :  { %v649_v11 = vadd.f32 %v648_v47, %v557_v63  ;;  %v2032_v47 = vld [vmem:[%s4467_s1 + $0x6a8] sm:$0xff] }
 0x1a1   :  { %v832_v34 = vpop.f32.mrf.mxu1  ;;  %1395 = vmatmul.f32.gmra.mxu0 %v1040_v48  ;;  %1819 = vmatpush.msrb.mxu1 %v2032_v47  ;;  %v3571_v47 = vld [vmem:[%s4468_s0 + $0x3b0] sm:$0xff] }
 0x1a2   :  { %v741_v17 = vadd.f32 %v740_v3, %v649_v11  ;;  %899 = vmatmul.f32.gmra.mxu2 %v3445_v62  ;;  %1306 = vmatmul.f32.gmra.mxu3 %v1046_v54  ;;  %v1983_v3 = vld [vmem:[%s4467_s1 + $0x520] sm:$0xff] }
 0x1a3   :  { %1544 = vmatpush.msrb.mxu2 %v1983_v3  ;;  %1728 = vmatpush.msrb.mxu0 %v2015_v32  ;;  %v1081_v3 = vld [vmem:[%s4468_s0 + $0x380] sm:$0xff] }
 0x1a4   :  { %v3454_v29 = vadd.f32 %v832_v34, %v741_v17  ;;  %1487 = vmatmul.f32.gmra.mxu1 %v1041_v60  ;;  %v1061_v34 = vld [vmem:[%s4468_s0 + $0x2e0] sm:$0xff]  ;;  %v1067_v17 = vld [vmem:[%s4468_s0 + $0x310] sm:$0xff] }
 0x1a5   :  { %v559_v5 = vpop.f32.mrf.mxu2  ;;  %v651_v6 = vpop.f32.mrf.mxu3  ;;  %v3520_v60 = vld [vmem:[%s4468_s0 + $0x340] sm:$0xff] }
 0x1a6   :  { %v560_v59 = vadd.f32 %v559_v5, %v2857_v25  ;;  %v743_v2 = vpop.f32.mrf.mxu0 }
 0x1a8   :  { %v652_v25 = vadd.f32 %v651_v6, %v560_v59  ;;  %v1999_v6 = vld [vmem:[%s4467_s1 + $0x5a0] sm:$0xff]  ;;  %v1062_v59 = vld [vmem:[%s4468_s0 + $0x2e8] sm:$0xff] }
 0x1a9   :  { %v835_v35 = vpop.f32.mrf.mxu1  ;;  %1398 = vmatmul.f32.gmra.mxu0 %v1047_v10  ;;  %1636 = vmatpush.msrb.mxu3 %v1999_v6 }
 0x1aa   :  { %v744_v14 = vadd.f32 %v743_v2, %v652_v25  ;;  %902 = vmatmul.f32.gmra.mxu2 %v3466_v45  ;;  %1309 = vmatmul.f32.gmra.mxu3 %v1053_v56 }
 0x1ac   :  { %v3481_v31 = vadd.f32 %v835_v35, %v744_v14  ;;  %1490 = vmatmul.f32.gmra.mxu1 %v1048_v39  ;;  %v1068_v39 = vld [vmem:[%s4468_s0 + $0x318] sm:$0xff] }
 0x1ad   :  { %v562_v41 = vpop.f32.mrf.mxu2  ;;  %v654_v51 = vpop.f32.mrf.mxu3  ;;  %v3541_v14 = vld [vmem:[%s4468_s0 + $0x378] sm:$0xff] }
 0x1ae   :  { %v563_v12 = vadd.f32 %v562_v41, %v2884_v42  ;;  %v746_v20 = vpop.f32.mrf.mxu0  ;;  %v1055_v42 = vld [vmem:[%s4468_s0 + $0x2b0] sm:$0xff]  ;;  %v2031_v41 = vld [vmem:[%s4467_s1 + $0x6a0] sm:$0xff] }
 0x1af   :  { %1820 = vmatpush.msrb.mxu1 %v2031_v41  ;;  %v1089_v41 = vld [vmem:[%s4468_s0 + $0x3c0] sm:$0xff] }
 0x1b0   :  { %v655_v44 = vadd.f32 %v654_v51, %v563_v12  ;;  %v1069_v12 = vld [vmem:[%s4468_s0 + $0x320] sm:$0xff] }
 0x1b1   :  { %v838_v0 = vpop.f32.mrf.mxu1  ;;  %1401 = vmatmul.f32.gmra.mxu0 %v1054_v37  ;;  %v1998_v37 = vld [vmem:[%s4467_s1 + $0x598] sm:$0xff] }
 0x1b2   :  { %v747_v27 = vadd.f32 %v746_v20, %v655_v44  ;;  %905 = vmatmul.f32.gmra.mxu2 %v3493_v58  ;;  %1312 = vmatmul.f32.gmra.mxu3 %v1060_v46 }
 0x1b3   :  { %1637 = vmatpush.msrb.mxu3 %v1998_v37  ;;  %v1090_v37 = vld [vmem:[%s4468_s0 + $0x3c8] sm:$0xff] }
 0x1b4   :  { %v3508_v63 = vadd.f32 %v838_v0, %v747_v27  ;;  %1493 = vmatmul.f32.gmra.mxu1 %v1055_v42 }
 0x1b5   :  { %v565_v48 = vpop.f32.mrf.mxu2  ;;  %v657_v36 = vpop.f32.mrf.mxu3 }
 0x1b6   :  { %v566_v54 = vadd.f32 %v565_v48, %v2911_v61  ;;  %v749_v11 = vpop.f32.mrf.mxu0 }
 0x1b8   :  { %v658_v5 = vadd.f32 %v657_v36, %v566_v54 }
 0x1b9   :  { %v841_v61 = vpop.f32.mrf.mxu1  ;;  %1404 = vmatmul.f32.gmra.mxu0 %v1061_v34 }
 0x1ba   :  { %v750_v2 = vadd.f32 %v749_v11, %v658_v5  ;;  %908 = vmatmul.f32.gmra.mxu2 %v3520_v60  ;;  %1315 = vmatmul.f32.gmra.mxu3 %v1067_v17  ;;  %v2014_v11 = vld [vmem:[%s4467_s1 + $0x618] sm:$0xff] }
 0x1bb   :  { %1729 = vmatpush.msrb.mxu0 %v2014_v11  ;;  %v2030_v17 = vld [vmem:[%s4467_s1 + $0x698] sm:$0xff]  ;;  %v1097_v11 = vld [vmem:[%s4468_s0 + $0x400] sm:$0xff] }
 0x1bc   :  { %v3532_v10 = vadd.f32 %v841_v61, %v750_v2  ;;  %1496 = vmatmul.f32.gmra.mxu1 %v1062_v59  ;;  %v1082_v2 = vld [vmem:[%s4468_s0 + $0x388] sm:$0xff] }
 0x1bd   :  { %v568_v9 = vpop.f32.mrf.mxu2  ;;  %v660_v56 = vpop.f32.mrf.mxu3  ;;  %1821 = vmatpush.msrb.mxu1 %v2030_v17  ;;  %v2012_v17 = vld [vmem:[%s4467_s1 + $0x608] sm:$0xff] }
 0x1be   :  { %v569_v25 = vadd.f32 %v568_v9, %v2932_v15  ;;  %v752_v35 = vpop.f32.mrf.mxu0  ;;  %v1982_v15 = vld [vmem:[%s4467_s1 + $0x518] sm:$0xff]  ;;  %v3599_v9 = vld [vmem:[%s4468_s0 + $0x3e8] sm:$0xff] }
 0x1bf   :  { %1545 = vmatpush.msrb.mxu2 %v1982_v15 }
 0x1c0   :  { %v661_v23 = vadd.f32 %v660_v56, %v569_v25  ;;  %v1088_v56 = vld [vmem:[%s4468_s0 + $0x3b8] sm:$0xff]  ;;  %v1997_v25 = vld [vmem:[%s4467_s1 + $0x590] sm:$0xff] }
 0x1c1   :  { %v844_v51 = vpop.f32.mrf.mxu1  ;;  %1407 = vmatmul.f32.gmra.mxu0 %v1068_v39  ;;  %v1083_v39 = vld [vmem:[%s4468_s0 + $0x390] sm:$0xff]  ;;  %1638 = vmatpush.msrb.mxu3 %v1997_v25 }
 0x1c2   :  { %v753_v20 = vadd.f32 %v752_v35, %v661_v23  ;;  %911 = vmatmul.f32.gmra.mxu2 %v3541_v14  ;;  %1318 = vmatmul.f32.gmra.mxu3 %v1074_v43  ;;  %v3698_v25 = vld [vmem:[%s4468_s0 + $0x490] sm:$0xff] }
 0x1c4   :  { %v3562_v46 = vadd.f32 %v844_v51, %v753_v20  ;;  %1499 = vmatmul.f32.gmra.mxu1 %v1069_v12  ;;  %v3631_v51 = vld [vmem:[%s4468_s0 + $0x420] sm:$0xff]  ;;  %v1095_v12 = vld [vmem:[%s4468_s0 + $0x3f0] sm:$0xff] }
 0x1c5   :  { %v571_v44 = vpop.f32.mrf.mxu2  ;;  %v663_v0 = vpop.f32.mrf.mxu3 }
 0x1c6   :  { %v572_v42 = vadd.f32 %v571_v44, %v2962_v40  ;;  %v755_v27 = vpop.f32.mrf.mxu0  ;;  %v1076_v40 = vld [vmem:[%s4468_s0 + $0x358] sm:$0xff]  ;;  %v1980_v44 = vld [vmem:[%s4467_s1 + $0x508] sm:$0xff] }
 0x1c8   :  { %v664_v48 = vadd.f32 %v663_v0, %v572_v42  ;;  %v2029_v0 = vld [vmem:[%s4467_s1 + $0x690] sm:$0xff]  ;;  %v1996_v42 = vld [vmem:[%s4467_s1 + $0x588] sm:$0xff] }
 0x1c9   :  { %v847_v36 = vpop.f32.mrf.mxu1  ;;  %1410 = vmatmul.f32.gmra.mxu0 %v1075_v7  ;;  %1639 = vmatpush.msrb.mxu3 %v1996_v42  ;;  %v1110_v42 = vld [vmem:[%s4468_s0 + $0x468] sm:$0xff] }
 0x1ca   :  { %v756_v54 = vadd.f32 %v755_v27, %v664_v48  ;;  %914 = vmatmul.f32.gmra.mxu2 %v3571_v47  ;;  %1321 = vmatmul.f32.gmra.mxu3 %v1081_v3 }
 0x1cb   :  { %1822 = vmatpush.msrb.mxu1 %v2029_v0 }
 0x1cc   :  { %v3583_v34 = vadd.f32 %v847_v36, %v756_v54  ;;  %1502 = vmatmul.f32.gmra.mxu1 %v1076_v40  ;;  %v1096_v36 = vld [vmem:[%s4468_s0 + $0x3f8] sm:$0xff]  ;;  %v1102_v54 = vld [vmem:[%s4468_s0 + $0x428] sm:$0xff] }
 0x1cd   :  { %v867_v5 = vpop.f32.mrf.mxu2  ;;  %v3588_v6 = vpop.f32.mrf.mxu3  ;;  %v3669_v40 = vld [vmem:[%s4468_s0 + $0x458] sm:$0xff] }
 0x1ce   :  { %v868_v61 = vadd.f32 %v867_v5, %v3008_v30  ;;  %v3591_v59 = vpop.f32.mrf.mxu0  ;;  %v1981_v30 = vld [vmem:[%s4467_s1 + $0x510] sm:$0xff] }
 0x1cf   :  { %1546 = vmatpush.msrb.mxu2 %v1981_v30  ;;  %v1103_v30 = vld [vmem:[%s4468_s0 + $0x430] sm:$0xff] }
 0x1d0   :  { %943 = vst.msk [vmem:[%s4469_s2] sm:$0xff] %vm942_vm0, %v868_v61 }
 0x1d1   :  { %v3614_v35 = vpop.f32.mrf.mxu1  ;;  %1413 = vmatmul.f32.gmra.mxu0 %v1082_v2  ;;  %1547 = vmatpush.msrb.mxu2 %v1980_v44 }
 0x1d2   :  { %917 = vmatmul.f32.gmra.mxu2 %v3599_v9  ;;  %1324 = vmatmul.f32.gmra.mxu3 %v1088_v56 }
 0x1d4   :  { %1505 = vmatmul.f32.gmra.mxu1 %v1083_v39  ;;  %v1109_v39 = vld [vmem:[%s4468_s0 + $0x460] sm:$0xff] }
 0x1d5   :  { %v870_v43 = vpop.f32.mrf.mxu2  ;;  %v3620_v23 = vpop.f32.mrf.mxu3 }
 0x1d6   :  { %v871_v32 = vadd.f32 %v870_v43, %v3027_v57  ;;  %v3623_v15 = vpop.f32.mrf.mxu0  ;;  %v2013_v57 = vld [vmem:[%s4467_s1 + $0x610] sm:$0xff]  ;;  %v1979_v43 = vld [vmem:[%s4467_s1 + $0x500] sm:$0xff] }
 0x1d7   :  { %1730 = vmatpush.msrb.mxu0 %v2013_v57  ;;  %1548 = vmatpush.msrb.mxu2 %v1979_v43  ;;  %v1123_v43 = vld [vmem:[%s4468_s0 + $0x4d0] sm:$0xff] }
 0x1d8   :  { %944 = vst.msk [vmem:[%s4469_s2 + $0x8] sm:$0xff] %vm942_vm0, %v871_v32  ;;  %v1995_v32 = vld [vmem:[%s4467_s1 + $0x580] sm:$0xff] }
 0x1d9   :  { %v3643_v20 = vpop.f32.mrf.mxu1  ;;  %1416 = vmatmul.f32.gmra.mxu0 %v1089_v41  ;;  %1640 = vmatpush.msrb.mxu3 %v1995_v32  ;;  %v1118_v32 = vld [vmem:[%s4468_s0 + $0x4a8] sm:$0xff] }
 0x1da   :  { %920 = vmatmul.f32.gmra.mxu2 %v3631_v51  ;;  %1327 = vmatmul.f32.gmra.mxu3 %v1095_v12  ;;  %v1104_v12 = vld [vmem:[%s4468_s0 + $0x438] sm:$0xff] }
 0x1db   :  { %1731 = vmatpush.msrb.mxu0 %v2012_v17 }
 0x1dc   :  { %1508 = vmatmul.f32.gmra.mxu1 %v1090_v37 }
 0x1dd   :  { %v873_v27 = vpop.f32.mrf.mxu2  ;;  %v3658_v7 = vpop.f32.mrf.mxu3 }
 0x1de   :  { %v874_v3 = vadd.f32 %v873_v27, %v3052_v24  ;;  %v3661_v48 = vpop.f32.mrf.mxu0  ;;  %v3733_v27 = vld [vmem:[%s4468_s0 + $0x4c8] sm:$0xff] }
 0x1e0   :  { %945 = vst.msk [vmem:[%s4469_s2 + $0x10] sm:$0xff] %vm942_vm0, %v874_v3  ;;  %v1116_v3 = vld [vmem:[%s4468_s0 + $0x498] sm:$0xff] }
 0x1e1   :  { %v3678_v24 = vpop.f32.mrf.mxu1  ;;  %1419 = vmatmul.f32.gmra.mxu0 %v1096_v36 }
 0x1e2   :  { %923 = vmatmul.f32.gmra.mxu2 %v3669_v40  ;;  %1330 = vmatmul.f32.gmra.mxu3 %v1102_v54  ;;  %v1111_v54 = vld [vmem:[%s4468_s0 + $0x470] sm:$0xff] }
 0x1e4   :  { %1511 = vmatmul.f32.gmra.mxu1 %v1097_v11  ;;  %v2027_v11 = vld [vmem:[%s4467_s1 + $0x680] sm:$0xff] }
 0x1e5   :  { %v876_v5 = vpop.f32.mrf.mxu2  ;;  %v3687_v61 = vpop.f32.mrf.mxu3 }
 0x1e6   :  { %v877_v2 = vadd.f32 %v876_v5, %v3080_v1  ;;  %v3690_v56 = vpop.f32.mrf.mxu0  ;;  %v2028_v1 = vld [vmem:[%s4467_s1 + $0x688] sm:$0xff] }
 0x1e7   :  { %1823 = vmatpush.msrb.mxu1 %v2028_v1  ;;  %v3765_v1 = vld [vmem:[%s4468_s0 + $0x500] sm:$0xff] }
 0x1e8   :  { %946 = vst.msk [vmem:[%s4469_s2 + $0x18] sm:$0xff] %vm942_vm0, %v877_v2 }
 0x1e9   :  { %v3716_v41 = vpop.f32.mrf.mxu1  ;;  %1422 = vmatmul.f32.gmra.mxu0 %v1103_v30  ;;  %1824 = vmatpush.msrb.mxu1 %v2027_v11  ;;  %v1125_v11 = vld [vmem:[%s4468_s0 + $0x4e0] sm:$0xff] }
 0x1ea   :  { %926 = vmatmul.f32.gmra.mxu2 %v3698_v25  ;;  %1333 = vmatmul.f32.gmra.mxu3 %v1109_v39  ;;  %v1117_v39 = vld [vmem:[%s4468_s0 + $0x4a0] sm:$0xff] }
 0x1ec   :  { %1514 = vmatmul.f32.gmra.mxu1 %v1104_v12 }
 0x1ed   :  { %v879_v57 = vpop.f32.mrf.mxu2  ;;  %v3722_v37 = vpop.f32.mrf.mxu3 }
 0x1ee   :  { %v880_v44 = vadd.f32 %v879_v57, %v3099_v22  ;;  %v3725_v0 = vpop.f32.mrf.mxu0  ;;  %v2011_v22 = vld [vmem:[%s4467_s1 + $0x600] sm:$0xff] }
 0x1ef   :  { %1732 = vmatpush.msrb.mxu0 %v2011_v22  ;;  %v3791_v22 = vld [vmem:[%s4468_s0 + $0x538] sm:$0xff] }
 0x1f0   :  { %947 = vst.msk [vmem:[%s4469_s2 + $0x20] sm:$0xff] %vm942_vm0, %v880_v44 }
 0x1f1   :  { %v3745_v36 = vpop.f32.mrf.mxu1  ;;  %1425 = vmatmul.f32.gmra.mxu0 %v1110_v42  ;;  %4471 = vst [vmem:[#allocation2_spill] sm:$0xff] %v3791_v22 }
 0x1f2   :  { %929 = vmatmul.f32.gmra.mxu2 %v3733_v27  ;;  %1336 = vmatmul.f32.gmra.mxu3 %v1116_v3  ;;  %v1124_v3 = vld [vmem:[%s4468_s0 + $0x4d8] sm:$0xff] }
 0x1f4   :  { %1517 = vmatmul.f32.gmra.mxu1 %v1111_v54  ;;  %v1130_v54 = vld [vmem:[%s4468_s0 + $0x508] sm:$0xff] }
 0x1f5   :  { %v882_v17 = vpop.f32.mrf.mxu2  ;;  %v3754_v5 = vpop.f32.mrf.mxu3 }
 0x1f6   :  { %v883_v2 = vadd.f32 %v882_v17, %v3124_v52  ;;  %v3757_v30 = vpop.f32.mrf.mxu0 }
 0x1f8   :  { %948 = vst.msk [vmem:[%s4469_s2 + $0x28] sm:$0xff] %vm942_vm0, %v883_v2 }
 0x1f9   :  { %v3774_v52 = vpop.f32.mrf.mxu1  ;;  %1428 = vmatmul.f32.gmra.mxu0 %v1117_v39 }
 0x1fa   :  { %932 = vmatmul.f32.gmra.mxu2 %v3765_v1  ;;  %1339 = vmatmul.f32.gmra.mxu3 %v1123_v43 }
 0x1fc   :  { %1520 = vmatmul.f32.gmra.mxu1 %v1118_v32  ;;  %v1131_v32 = vld [vmem:[%s4468_s0 + $0x510] sm:$0xff] }
 0x1fd   :  { %v885_v12 = vpop.f32.mrf.mxu2  ;;  %v3780_v57 = vpop.f32.mrf.mxu3 }
 0x1fe   :  { %v886_v44 = vadd.f32 %v885_v12, %v3149_v13  ;;  %v3783_v42 = vpop.f32.mrf.mxu0  ;;  %v185_v12 = vld [vmem:[%s4468_s0 + $0x570] sm:$0x7] }
 0x200   :  { %949 = vst.msk [vmem:[%s4469_s2 + $0x30] sm:$0xff] %vm942_vm0, %v886_v44  ;;  %v1137_v44 = vld [vmem:[%s4468_s0 + $0x540] sm:$0x7] }
 0x201   :  { %v3800_v13 = vpop.f32.mrf.mxu1  ;;  %1431 = vmatmul.f32.gmra.mxu0 %v1124_v3  ;;  %v1132_v3 = vld [vmem:[%s4468_s0 + $0x518] sm:$0xff] }
 0x202   :  { %935 = vmatmul.f32.gmra.mxu2 %v3791_v22  ;;  %1342 = vmatmul.f32.gmra.mxu3 %v1130_v54 }
 0x204   :  { %1523 = vmatmul.f32.gmra.mxu1 %v1125_v11 }
 0x205   :  { %v888_v17 = vpop.f32.mrf.mxu2  ;;  %v3806_v2 = vpop.f32.mrf.mxu3 }
 0x206   :  { %v889_v39 = vadd.f32 %v888_v17, %v3168_v21  ;;  %v3809_v43 = vpop.f32.mrf.mxu0 }
 0x208   :  { %950 = vst.msk [vmem:[%s4469_s2 + $0x38] sm:$0xff] %vm942_vm0, %v889_v39  ;;  %v1138_v39 = vld [vmem:[%s4468_s0 + $0x548] sm:$0x7] }
 0x209   :  { %v3824_v21 = vpop.f32.mrf.mxu1  ;;  %1434 = vmatmul.f32.gmra.mxu0 %v1131_v32  ;;  %v972_v32 = vld [vmem:[%s4468_s0 + $0x18] sm:$0xff] }
 0x20a   :  { %938 = vmatmul.f32.gmra.mxu2 %v185_v12  ;;  %1345 = vmatmul.f32.gmra.mxu3 %v1137_v44  ;;  %v973_v12 = vld [vmem:[%s4468_s0 + $0x20] sm:$0xff]  ;;  %v1139_v44 = vld [vmem:[%s4468_s0 + $0x550] sm:$0x7] }
 0x20c   :  { %1526 = vmatmul.f32.gmra.mxu1 %v1132_v3 }
 0x20d   :  { %v891_v54 = vpop.f32.mrf.mxu2  ;;  %v3829_v11 = vpop.f32.mrf.mxu3 }
 0x20e   :  { %4472 = vst [vmem:[#allocation3_spill] sm:$0xff] %v3829_v11  ;;  %v892_v17 = vadd.f32 %v891_v54, %v3196_v16  ;;  %v3832_v22 = vpop.f32.mrf.mxu0 }
 0x20f   :  { %4473 = vst [vmem:[#allocation4_spill] sm:$0xff] %v3832_v22 }
 0x210   :  { %951 = vst.msk [vmem:[%s4469_s2 + $0x40] sm:$0xff] %vm942_vm0, %v892_v17  ;;  %v974_v17 = vld [vmem:[%s4468_s0 + $0x28] sm:$0xff] }
 0x211   :  { %v3847_v16 = vpop.f32.mrf.mxu1  ;;  %1437 = vmatmul.f32.gmra.mxu0 %v1138_v39  ;;  %v979_v39 = vld [vmem:[%s4468_s0 + $0x50] sm:$0xff] }
 0x212   :  { %1549 = vmatmul.f32.vlgmr.msrb.gmra.mxu2 %v972_v32  ;;  %1641 = vmatmul.f32.vlgmr.msrb.gmra.mxu3 %v973_v12  ;;  %v980_v32 = vld [vmem:[%s4468_s0 + $0x58] sm:$0xff]  ;;  %v975_v12 = vld [vmem:[%s4468_s0 + $0x30] sm:$0xff] }
 0x214   :  { %1529 = vmatmul.f32.gmra.mxu1 %v1139_v44 }
 0x215   :  { %v894_v3 = vpop.f32.mrf.mxu2  ;;  %v3852_v54 = vpop.f32.mrf.mxu3 }
 0x216   :  { %4474 = vst [vmem:[#allocation5_spill] sm:$0xff] %v3852_v54  ;;  %v895_v22 = vadd.f32 %v894_v3, %v3218_v18  ;;  %v3855_v11 = vpop.f32.mrf.mxu0 }
 0x217   :  { %4475 = vst [vmem:[#allocation6_spill] sm:$0xff] %v3855_v11 }
 0x218   :  { %952 = vst.msk [vmem:[%s4469_s2 + $0x48] sm:$0xff] %vm942_vm0, %v895_v22  ;;  %v981_v22 = vld [vmem:[%s4468_s0 + $0x60] sm:$0xff] }
 0x219   :  { %v3870_v18 = vpop.f32.mrf.mxu1  ;;  %1733 = vmatmul.f32.vlgmr.msrb.gmra.mxu0 %v974_v17  ;;  %v986_v17 = vld [vmem:[%s4468_s0 + $0x88] sm:$0xff] }
 0x21a   :  { %1552 = vmatmul.f32.gmra.mxu2 %v979_v39  ;;  %1644 = vmatmul.f32.gmra.mxu3 %v980_v32  ;;  %v987_v39 = vld [vmem:[%s4468_s0 + $0x90] sm:$0xff]  ;;  %v982_v32 = vld [vmem:[%s4468_s0 + $0x68] sm:$0xff] }
 0x21c   :  { %1825 = vmatmul.f32.vlgmr.msrb.gmra.mxu1 %v975_v12 }
 0x21d   :  { %v897_v44 = vpop.f32.mrf.mxu2  ;;  %v3875_v3 = vpop.f32.mrf.mxu3 }
 0x21e   :  { %4476 = vst [vmem:[#allocation7_spill] sm:$0xff] %v3875_v3  ;;  %v898_v11 = vadd.f32 %v897_v44, %v3238_v28  ;;  %v3878_v54 = vpop.f32.mrf.mxu0 }
 0x21f   :  { %4477 = vst [vmem:[#allocation8_spill] sm:$0xff] %v3878_v54 }
 0x220   :  { %953 = vst.msk [vmem:[%s4469_s2 + $0x50] sm:$0xff] %vm942_vm0, %v898_v11  ;;  %v988_v11 = vld [vmem:[%s4468_s0 + $0x98] sm:$0xff] }
 0x221   :  { %v3893_v28 = vpop.f32.mrf.mxu1  ;;  %1736 = vmatmul.f32.gmra.mxu0 %v981_v22  ;;  %v993_v22 = vld [vmem:[%s4468_s0 + $0xc0] sm:$0xff] }
 0x222   :  { %1555 = vmatmul.f32.gmra.mxu2 %v986_v17  ;;  %1647 = vmatmul.f32.gmra.mxu3 %v987_v39  ;;  %v994_v17 = vld [vmem:[%s4468_s0 + $0xc8] sm:$0xff]  ;;  %v989_v39 = vld [vmem:[%s4468_s0 + $0xa0] sm:$0xff] }
 0x224   :  { %1828 = vmatmul.f32.gmra.mxu1 %v982_v32 }
 0x225   :  { %v900_v12 = vpop.f32.mrf.mxu2  ;;  %v3898_v44 = vpop.f32.mrf.mxu3 }
 0x226   :  { %4478 = vst [vmem:[#allocation9_spill] sm:$0xff] %v3898_v44  ;;  %v901_v54 = vadd.f32 %v900_v12, %v3266_v8  ;;  %v3901_v3 = vpop.f32.mrf.mxu0 }
 0x227   :  { %4479 = vst [vmem:[#allocation10_spill] sm:$0xff] %v3901_v3 }
 0x228   :  { %954 = vst.msk [vmem:[%s4469_s2 + $0x58] sm:$0xff] %vm942_vm0, %v901_v54  ;;  %v995_v54 = vld [vmem:[%s4468_s0 + $0xd0] sm:$0xff] }
 0x229   :  { %v3916_v8 = vpop.f32.mrf.mxu1  ;;  %1739 = vmatmul.f32.gmra.mxu0 %v988_v11  ;;  %v1000_v11 = vld [vmem:[%s4468_s0 + $0xf8] sm:$0xff] }
 0x22a   :  { %1558 = vmatmul.f32.gmra.mxu2 %v993_v22  ;;  %1650 = vmatmul.f32.gmra.mxu3 %v994_v17  ;;  %v1001_v22 = vld [vmem:[%s4468_s0 + $0x100] sm:$0xff]  ;;  %v996_v17 = vld [vmem:[%s4468_s0 + $0xd8] sm:$0xff] }
 0x22c   :  { %1831 = vmatmul.f32.gmra.mxu1 %v989_v39 }
 0x22d   :  { %v903_v32 = vpop.f32.mrf.mxu2  ;;  %v3921_v12 = vpop.f32.mrf.mxu3 }
 0x22e   :  { %4480 = vst [vmem:[#allocation11_spill] sm:$0xff] %v3921_v12  ;;  %v904_v3 = vadd.f32 %v903_v32, %v3286_v53  ;;  %v3924_v44 = vpop.f32.mrf.mxu0 }
 0x22f   :  { %4481 = vst [vmem:[#allocation12_spill] sm:$0xff] %v3924_v44 }
 0x230   :  { %955 = vst.msk [vmem:[%s4469_s2 + $0x60] sm:$0xff] %vm942_vm0, %v904_v3  ;;  %v1002_v3 = vld [vmem:[%s4468_s0 + $0x108] sm:$0xff] }
 0x231   :  { %v3939_v53 = vpop.f32.mrf.mxu1  ;;  %1742 = vmatmul.f32.gmra.mxu0 %v995_v54  ;;  %v1007_v54 = vld [vmem:[%s4468_s0 + $0x130] sm:$0xff] }
 0x232   :  { %1561 = vmatmul.f32.gmra.mxu2 %v1000_v11  ;;  %1653 = vmatmul.f32.gmra.mxu3 %v1001_v22  ;;  %v1008_v11 = vld [vmem:[%s4468_s0 + $0x138] sm:$0xff]  ;;  %v1003_v22 = vld [vmem:[%s4468_s0 + $0x110] sm:$0xff] }
 0x234   :  { %1834 = vmatmul.f32.gmra.mxu1 %v996_v17 }
 0x235   :  { %v906_v39 = vpop.f32.mrf.mxu2  ;;  %v3944_v32 = vpop.f32.mrf.mxu3 }
 0x236   :  { %4482 = vst [vmem:[#allocation13_spill] sm:$0xff] %v3944_v32  ;;  %v907_v44 = vadd.f32 %v906_v39, %v3307_v55  ;;  %v3947_v12 = vpop.f32.mrf.mxu0 }
 0x237   :  { %4483 = vst [vmem:[#allocation14_spill] sm:$0xff] %v3947_v12 }
 0x238   :  { %956 = vst.msk [vmem:[%s4469_s2 + $0x68] sm:$0xff] %vm942_vm0, %v907_v44  ;;  %v1009_v44 = vld [vmem:[%s4468_s0 + $0x140] sm:$0xff] }
 0x239   :  { %v3962_v55 = vpop.f32.mrf.mxu1  ;;  %1745 = vmatmul.f32.gmra.mxu0 %v1002_v3  ;;  %v1014_v3 = vld [vmem:[%s4468_s0 + $0x168] sm:$0xff] }
 0x23a   :  { %1564 = vmatmul.f32.gmra.mxu2 %v1007_v54  ;;  %1656 = vmatmul.f32.gmra.mxu3 %v1008_v11  ;;  %v1015_v54 = vld [vmem:[%s4468_s0 + $0x170] sm:$0xff]  ;;  %v1010_v11 = vld [vmem:[%s4468_s0 + $0x148] sm:$0xff] }
 0x23c   :  { %1837 = vmatmul.f32.gmra.mxu1 %v1003_v22 }
 0x23d   :  { %v909_v17 = vpop.f32.mrf.mxu2  ;;  %v3967_v39 = vpop.f32.mrf.mxu3 }
 0x23e   :  { %4484 = vst [vmem:[#allocation15_spill] sm:$0xff] %v3967_v39  ;;  %v910_v12 = vadd.f32 %v909_v17, %v3334_v19  ;;  %v3970_v32 = vpop.f32.mrf.mxu0 }
 0x23f   :  { %4485 = vst [vmem:[#allocation16_spill] sm:$0xff] %v3970_v32 }
 0x240   :  { %957 = vst.msk [vmem:[%s4469_s2 + $0x70] sm:$0xff] %vm942_vm0, %v910_v12  ;;  %v1016_v12 = vld [vmem:[%s4468_s0 + $0x178] sm:$0xff] }
 0x241   :  { %v3985_v19 = vpop.f32.mrf.mxu1  ;;  %1748 = vmatmul.f32.gmra.mxu0 %v1009_v44  ;;  %v1021_v44 = vld [vmem:[%s4468_s0 + $0x1a0] sm:$0xff] }
 0x242   :  { %1567 = vmatmul.f32.gmra.mxu2 %v1014_v3  ;;  %1659 = vmatmul.f32.gmra.mxu3 %v1015_v54  ;;  %v1022_v3 = vld [vmem:[%s4468_s0 + $0x1a8] sm:$0xff]  ;;  %v1017_v54 = vld [vmem:[%s4468_s0 + $0x180] sm:$0xff] }
 0x244   :  { %1840 = vmatmul.f32.gmra.mxu1 %v1010_v11 }
 0x245   :  { %v912_v22 = vpop.f32.mrf.mxu2  ;;  %v3990_v17 = vpop.f32.mrf.mxu3 }
 0x246   :  { %4486 = vst [vmem:[#allocation17_spill] sm:$0xff] %v3990_v17  ;;  %v913_v32 = vadd.f32 %v912_v22, %v3352_v38  ;;  %v3993_v39 = vpop.f32.mrf.mxu0 }
 0x247   :  { %4487 = vst [vmem:[#allocation18_spill] sm:$0xff] %v3993_v39 }
 0x248   :  { %958 = vst.msk [vmem:[%s4469_s2 + $0x78] sm:$0xff] %vm942_vm0, %v913_v32  ;;  %v1023_v32 = vld [vmem:[%s4468_s0 + $0x1b0] sm:$0xff] }
 0x249   :  { %v4008_v38 = vpop.f32.mrf.mxu1  ;;  %1751 = vmatmul.f32.gmra.mxu0 %v1016_v12  ;;  %v1028_v12 = vld [vmem:[%s4468_s0 + $0x1d8] sm:$0xff] }
 0x24a   :  { %1570 = vmatmul.f32.gmra.mxu2 %v1021_v44  ;;  %1662 = vmatmul.f32.gmra.mxu3 %v1022_v3  ;;  %v1029_v44 = vld [vmem:[%s4468_s0 + $0x1e0] sm:$0xff]  ;;  %v1024_v3 = vld [vmem:[%s4468_s0 + $0x1b8] sm:$0xff] }
 0x24c   :  { %1843 = vmatmul.f32.gmra.mxu1 %v1017_v54 }
 0x24d   :  { %v915_v11 = vpop.f32.mrf.mxu2  ;;  %v4013_v22 = vpop.f32.mrf.mxu3 }
 0x24e   :  { %4488 = vst [vmem:[#allocation19_spill] sm:$0xff] %v4013_v22  ;;  %v916_v39 = vadd.f32 %v915_v11, %v3376_v4  ;;  %v4016_v17 = vpop.f32.mrf.mxu0 }
 0x24f   :  { %4489 = vst [vmem:[#allocation20_spill] sm:$0xff] %v4016_v17 }
 0x250   :  { %959 = vst.msk [vmem:[%s4469_s2 + $0x80] sm:$0xff] %vm942_vm0, %v916_v39  ;;  %v1030_v39 = vld [vmem:[%s4468_s0 + $0x1e8] sm:$0xff] }
 0x251   :  { %v4031_v4 = vpop.f32.mrf.mxu1  ;;  %1754 = vmatmul.f32.gmra.mxu0 %v1023_v32  ;;  %v1035_v32 = vld [vmem:[%s4468_s0 + $0x210] sm:$0xff] }
 0x252   :  { %1573 = vmatmul.f32.gmra.mxu2 %v1028_v12  ;;  %1665 = vmatmul.f32.gmra.mxu3 %v1029_v44  ;;  %v1036_v12 = vld [vmem:[%s4468_s0 + $0x218] sm:$0xff]  ;;  %v1031_v44 = vld [vmem:[%s4468_s0 + $0x1f0] sm:$0xff] }
 0x254   :  { %1846 = vmatmul.f32.gmra.mxu1 %v1024_v3 }
 0x255   :  { %v918_v54 = vpop.f32.mrf.mxu2  ;;  %v4036_v11 = vpop.f32.mrf.mxu3 }
 0x256   :  { %4490 = vst [vmem:[#allocation21_spill] sm:$0xff] %v4036_v11  ;;  %v919_v17 = vadd.f32 %v918_v54, %v3406_v49  ;;  %v4039_v22 = vpop.f32.mrf.mxu0 }
 0x257   :  { %4491 = vst [vmem:[#allocation22_spill] sm:$0xff] %v4039_v22 }
 0x258   :  { %960 = vst.msk [vmem:[%s4469_s2 + $0x88] sm:$0xff] %vm942_vm0, %v919_v17  ;;  %v1037_v17 = vld [vmem:[%s4468_s0 + $0x220] sm:$0xff] }
 0x259   :  { %v4054_v49 = vpop.f32.mrf.mxu1  ;;  %1757 = vmatmul.f32.gmra.mxu0 %v1030_v39  ;;  %v1042_v39 = vld [vmem:[%s4468_s0 + $0x248] sm:$0xff] }
 0x25a   :  { %1576 = vmatmul.f32.gmra.mxu2 %v1035_v32  ;;  %1668 = vmatmul.f32.gmra.mxu3 %v1036_v12  ;;  %v1043_v32 = vld [vmem:[%s4468_s0 + $0x250] sm:$0xff] }
 0x25c   :  { %1849 = vmatmul.f32.gmra.mxu1 %v1031_v44 }
 0x25d   :  { %v921_v3 = vpop.f32.mrf.mxu2  ;;  %v4059_v54 = vpop.f32.mrf.mxu3 }
 0x25e   :  { %4492 = vst [vmem:[#allocation23_spill] sm:$0xff] %v4059_v54  ;;  %v922_v22 = vadd.f32 %v921_v3, %v3427_v26  ;;  %v4062_v11 = vpop.f32.mrf.mxu0  ;;  %v1044_v54 = vld [vmem:[%s4468_s0 + $0x258] sm:$0xff] }
 0x25f   :  { %4493 = vst [vmem:[#allocation24_spill] sm:$0xff] %v4062_v11 }
 0x260   :  { %961 = vst.msk [vmem:[%s4469_s2 + $0x90] sm:$0xff] %vm942_vm0, %v922_v22  ;;  %v1049_v22 = vld [vmem:[%s4468_s0 + $0x280] sm:$0xff] }
 0x261   :  { %v4077_v26 = vpop.f32.mrf.mxu1  ;;  %1760 = vmatmul.f32.gmra.mxu0 %v1037_v17  ;;  %v1050_v17 = vld [vmem:[%s4468_s0 + $0x288] sm:$0xff] }
 0x262   :  { %1579 = vmatmul.f32.gmra.mxu2 %v1042_v39  ;;  %1671 = vmatmul.f32.gmra.mxu3 %v1043_v32 }
 0x264   :  { %1852 = vmatmul.f32.gmra.mxu1 %v3394_v50 }
 0x265   :  { %v924_v12 = vpop.f32.mrf.mxu2  ;;  %v4080_v44 = vpop.f32.mrf.mxu3 }
 0x266   :  { %v925_v3 = vadd.f32 %v924_v12, %v3454_v29  ;;  %v4083_v11 = vpop.f32.mrf.mxu0 }
 0x267   :  { %4494 = vst [vmem:[#allocation25_spill] sm:$0xff] %v4083_v11  ;;  %v1051_v11 = vld [vmem:[%s4468_s0 + $0x290] sm:$0xff] }
 0x268   :  { %962 = vst.msk [vmem:[%s4469_s2 + $0x98] sm:$0xff] %vm942_vm0, %v925_v3  ;;  %v1056_v3 = vld [vmem:[%s4468_s0 + $0x2b8] sm:$0xff] }
 0x269   :  { %v4098_v50 = vpop.f32.mrf.mxu1  ;;  %1763 = vmatmul.f32.gmra.mxu0 %v1044_v54  ;;  %v1057_v54 = vld [vmem:[%s4468_s0 + $0x2c0] sm:$0xff] }
 0x26a   :  { %1582 = vmatmul.f32.gmra.mxu2 %v1049_v22  ;;  %1674 = vmatmul.f32.gmra.mxu3 %v1050_v17 }
 0x26c   :  { %1855 = vmatmul.f32.gmra.mxu1 %v3415_v33 }
 0x26d   :  { %v927_v29 = vpop.f32.mrf.mxu2  ;;  %v4101_v39 = vpop.f32.mrf.mxu3 }
 0x26e   :  { %v928_v32 = vadd.f32 %v927_v29, %v3481_v31  ;;  %v4104_v12 = vpop.f32.mrf.mxu0 }
 0x26f   :  { %4495 = vst [vmem:[#allocation26_spill] sm:$0xff] %v4104_v12  ;;  %v1058_v12 = vld [vmem:[%s4468_s0 + $0x2c8] sm:$0xff] }
 0x270   :  { %963 = vst.msk [vmem:[%s4469_s2 + $0xa0] sm:$0xff] %vm942_vm0, %v928_v32  ;;  %v1063_v32 = vld [vmem:[%s4468_s0 + $0x2f0] sm:$0xff] }
 0x271   :  { %v4119_v33 = vpop.f32.mrf.mxu1  ;;  %1766 = vmatmul.f32.gmra.mxu0 %v1051_v11  ;;  %v1064_v11 = vld [vmem:[%s4468_s0 + $0x2f8] sm:$0xff] }
 0x272   :  { %1585 = vmatmul.f32.gmra.mxu2 %v1056_v3  ;;  %1677 = vmatmul.f32.gmra.mxu3 %v1057_v54 }
 0x274   :  { %1858 = vmatmul.f32.gmra.mxu1 %v3445_v62 }
 0x275   :  { %v930_v31 = vpop.f32.mrf.mxu2  ;;  %v4122_v22 = vpop.f32.mrf.mxu3 }
 0x276   :  { %v931_v17 = vadd.f32 %v930_v31, %v3508_v63  ;;  %v4125_v29 = vpop.f32.mrf.mxu0 }
 0x277   :  { %4496 = vst [vmem:[#allocation27_spill] sm:$0xff] %v4125_v29  ;;  %v1065_v29 = vld [vmem:[%s4468_s0 + $0x300] sm:$0xff] }
 0x278   :  { %964 = vst.msk [vmem:[%s4469_s2 + $0xa8] sm:$0xff] %vm942_vm0, %v931_v17  ;;  %v1070_v17 = vld [vmem:[%s4468_s0 + $0x328] sm:$0xff] }
 0x279   :  { %v4140_v62 = vpop.f32.mrf.mxu1  ;;  %1769 = vmatmul.f32.gmra.mxu0 %v1058_v12  ;;  %v1071_v12 = vld [vmem:[%s4468_s0 + $0x330] sm:$0xff] }
 0x27a   :  { %1588 = vmatmul.f32.gmra.mxu2 %v1063_v32  ;;  %1680 = vmatmul.f32.gmra.mxu3 %v1064_v11 }
 0x27c   :  { %1861 = vmatmul.f32.gmra.mxu1 %v3466_v45 }
 0x27d   :  { %v933_v63 = vpop.f32.mrf.mxu2  ;;  %v4143_v3 = vpop.f32.mrf.mxu3 }
 0x27e   :  { %v934_v54 = vadd.f32 %v933_v63, %v3532_v10  ;;  %v4146_v31 = vpop.f32.mrf.mxu0 }
 0x27f   :  { %4497 = vst [vmem:[#allocation28_spill] sm:$0xff] %v4146_v31  ;;  %v1072_v31 = vld [vmem:[%s4468_s0 + $0x338] sm:$0xff] }
 0x280   :  { %965 = vst.msk [vmem:[%s4469_s2 + $0xb0] sm:$0xff] %vm942_vm0, %v934_v54  ;;  %v1077_v54 = vld [vmem:[%s4468_s0 + $0x360] sm:$0xff] }
 0x281   :  { %v4161_v45 = vpop.f32.mrf.mxu1  ;;  %1772 = vmatmul.f32.gmra.mxu0 %v1065_v29  ;;  %v1078_v29 = vld [vmem:[%s4468_s0 + $0x368] sm:$0xff] }
 0x282   :  { %1591 = vmatmul.f32.gmra.mxu2 %v1070_v17  ;;  %1683 = vmatmul.f32.gmra.mxu3 %v1071_v12 }
 0x284   :  { %1864 = vmatmul.f32.gmra.mxu1 %v3493_v58 }
 0x285   :  { %v936_v10 = vpop.f32.mrf.mxu2  ;;  %v4164_v32 = vpop.f32.mrf.mxu3 }
 0x286   :  { %v937_v11 = vadd.f32 %v936_v10, %v3562_v46  ;;  %v4167_v63 = vpop.f32.mrf.mxu0 }
 0x287   :  { %4498 = vst [vmem:[#allocation29_spill] sm:$0xff] %v4167_v63  ;;  %v1079_v63 = vld [vmem:[%s4468_s0 + $0x370] sm:$0xff] }
 0x288   :  { %966 = vst.msk [vmem:[%s4469_s2 + $0xb8] sm:$0xff] %vm942_vm0, %v937_v11  ;;  %v1367_v11 = vadd.f32 %v3591_v59, %v3588_v6  ;;  %v1086_v6 = vld [vmem:[%s4468_s0 + $0x3a8] sm:$0xff]  ;;  %v1091_v59 = vld [vmem:[%s4468_s0 + $0x3d0] sm:$0xff] }
 0x289   :  { %v4182_v58 = vpop.f32.mrf.mxu1  ;;  %1775 = vmatmul.f32.gmra.mxu0 %v1072_v31  ;;  %v1084_v31 = vld [vmem:[%s4468_s0 + $0x398] sm:$0xff] }
 0x28a   :  { %1594 = vmatmul.f32.gmra.mxu2 %v1077_v54  ;;  %1686 = vmatmul.f32.gmra.mxu3 %v1078_v29  ;;  %v1459_v54 = vadd.f32 %v3614_v35, %v1367_v11  ;;  %v1370_v35 = vadd.f32 %v3623_v15, %v3620_v23  ;;  %v1093_v15 = vld [vmem:[%s4468_s0 + $0x3e0] sm:$0xff] }
 0x28c   :  { %1867 = vmatmul.f32.gmra.mxu1 %v3520_v60  ;;  %v1085_v60 = vld [vmem:[%s4468_s0 + $0x3a0] sm:$0xff] }
 0x28d   :  { %v939_v46 = vpop.f32.mrf.mxu2  ;;  %v4185_v17 = vpop.f32.mrf.mxu3 }
 0x28e   :  { %4499 = vst [vmem:[#allocation30_spill] sm:$0xff] %v4185_v17  ;;  %v940_v12 = vadd.f32 %v939_v46, %v3583_v34  ;;  %v4188_v10 = vpop.f32.mrf.mxu0 }
 0x28f   :  { %4500 = vst [vmem:[#allocation31_spill] sm:$0xff] %v4188_v10 }
 0x290   :  { %968 = vst.msk [vmem:[%s4469_s2 + $0xc0] sm:$0x7] %vm967_vm1, %v940_v12 }
 0x291   :  { %v4205_v34 = vpop.f32.mrf.mxu1  ;;  %1778 = vmatmul.f32.gmra.mxu0 %v1079_v63  ;;  %v1092_v63 = vld [vmem:[%s4468_s0 + $0x3d8] sm:$0xff] }
 0x292   :  { %4501 = vst [vmem:[#allocation32_spill] sm:$0xff] %v4205_v34  ;;  %1597 = vmatmul.f32.gmra.mxu2 %v1084_v31  ;;  %1689 = vmatmul.f32.gmra.mxu3 %v1085_v60  ;;  %v1462_v60 = vadd.f32 %v3643_v20, %v1370_v35  ;;  %v1098_v20 = vld [vmem:[%s4468_s0 + $0x408] sm:$0xff] }
 0x294   :  { %1870 = vmatmul.f32.gmra.mxu1 %v3541_v14 }
 0x295   :  { %v1550_v29 = vpop.f32.mrf.mxu2  ;;  %v1642_v46 = vpop.f32.mrf.mxu3 }
 0x296   :  { %v1551_v10 = vadd.f32 %v1550_v29, %v1459_v54  ;;  %v1734_v17 = vpop.f32.mrf.mxu0 }
 0x298   :  { %v1643_v14 = vadd.f32 %v1642_v46, %v1551_v10 }
 0x299   :  { %v1826_v12 = vpop.f32.mrf.mxu1  ;;  %1781 = vmatmul.f32.gmra.mxu0 %v1086_v6 }
 0x29a   :  { %v1735_v31 = vadd.f32 %v1734_v17, %v1643_v14  ;;  %1600 = vmatmul.f32.gmra.mxu2 %v1091_v59  ;;  %1692 = vmatmul.f32.gmra.mxu3 %v1092_v63  ;;  %v1373_v17 = vadd.f32 %v3661_v48, %v3658_v7  ;;  %v1100_v48 = vld [vmem:[%s4468_s0 + $0x418] sm:$0xff] }
 0x29c   :  { %v1827_v11 = vadd.f32 %v1826_v12, %v1735_v31  ;;  %1873 = vmatmul.f32.gmra.mxu1 %v3571_v47  ;;  %v1099_v47 = vld [vmem:[%s4468_s0 + $0x410] sm:$0xff]  ;;  %v1465_v59 = vadd.f32 %v3678_v24, %v1373_v17  ;;  %v1105_v24 = vld [vmem:[%s4468_s0 + $0x440] sm:$0xff] }
 0x29d   :  { %v1553_v54 = vpop.f32.mrf.mxu2  ;;  %v1645_v29 = vpop.f32.mrf.mxu3 }
 0x29e   :  { %2043 = vst.msk [vmem:[%s4469_s2 + $0xc8] sm:$0xff] %vm942_vm0, %v1827_v11  ;;  %v1554_v34 = vadd.f32 %v1553_v54, %v1462_v60  ;;  %v1737_v23 = vpop.f32.mrf.mxu0 }
 0x2a0   :  { %v1646_v10 = vadd.f32 %v1645_v29, %v1554_v34  ;;  %v1376_v34 = vadd.f32 %v3690_v56, %v3687_v61  ;;  %v1107_v56 = vld [vmem:[%s4468_s0 + $0x450] sm:$0xff] }
 0x2a1   :  { %v1829_v46 = vpop.f32.mrf.mxu1  ;;  %1784 = vmatmul.f32.gmra.mxu0 %v1093_v15 }
 0x2a2   :  { %v1738_v6 = vadd.f32 %v1737_v23, %v1646_v10  ;;  %1603 = vmatmul.f32.gmra.mxu2 %v1098_v20  ;;  %1695 = vmatmul.f32.gmra.mxu3 %v1099_v47  ;;  %v1468_v54 = vadd.f32 %v3716_v41, %v1376_v34  ;;  %v1112_v41 = vld [vmem:[%s4468_s0 + $0x478] sm:$0xff]  ;;  %v1379_v47 = vadd.f32 %v3725_v0, %v3722_v37  ;;  %v1114_v0 = vld [vmem:[%s4468_s0 + $0x488] sm:$0xff] }
 0x2a4   :  { %v1830_v63 = vadd.f32 %v1829_v46, %v1738_v6  ;;  %1876 = vmatmul.f32.gmra.mxu1 %v3599_v9  ;;  %v1106_v9 = vld [vmem:[%s4468_s0 + $0x448] sm:$0xff]  ;;  %v1471_v6 = vadd.f32 %v3745_v36, %v1379_v47  ;;  %v1119_v36 = vld [vmem:[%s4468_s0 + $0x4b0] sm:$0xff]  ;;  %v1388_v47 = vadd.f32 %v3809_v43, %v3806_v2 }
 0x2a5   :  { %v1556_v35 = vpop.f32.mrf.mxu2  ;;  %v1648_v14 = vpop.f32.mrf.mxu3  ;;  %v1135_v43 = vld [vmem:[%s4468_s0 + $0x530] sm:$0xff] }
 0x2a6   :  { %2044 = vst.msk [vmem:[%s4469_s2 + $0xd0] sm:$0xff] %vm942_vm0, %v1830_v63  ;;  %v1557_v12 = vadd.f32 %v1556_v35, %v1465_v59  ;;  %v1740_v7 = vpop.f32.mrf.mxu0 }
 0x2a8   :  { %v1649_v31 = vadd.f32 %v1648_v14, %v1557_v12  ;;  %v1382_v12 = vadd.f32 %v3757_v30, %v3754_v5  ;;  %v1121_v30 = vld [vmem:[%s4468_s0 + $0x4c0] sm:$0xff] }
 0x2a9   :  { %v1832_v60 = vpop.f32.mrf.mxu1  ;;  %1787 = vmatmul.f32.gmra.mxu0 %v1100_v48 }
 0x2aa   :  { %v1741_v11 = vadd.f32 %v1740_v7, %v1649_v31  ;;  %1606 = vmatmul.f32.gmra.mxu2 %v1105_v24  ;;  %1698 = vmatmul.f32.gmra.mxu3 %v1106_v9  ;;  %v1474_v9 = vadd.f32 %v3774_v52, %v1382_v12  ;;  %v1126_v52 = vld [vmem:[%s4468_s0 + $0x4e8] sm:$0xff] }
 0x2ac   :  { %v1833_v29 = vadd.f32 %v1832_v60, %v1741_v11  ;;  %1879 = vmatmul.f32.gmra.mxu1 %v3631_v51  ;;  %v1113_v51 = vld [vmem:[%s4468_s0 + $0x480] sm:$0xff] }
 0x2ad   :  { %v1559_v23 = vpop.f32.mrf.mxu2  ;;  %v1651_v15 = vpop.f32.mrf.mxu3 }
 0x2ae   :  { %2045 = vst.msk [vmem:[%s4469_s2 + $0xd8] sm:$0xff] %vm942_vm0, %v1833_v29  ;;  %v1560_v20 = vadd.f32 %v1559_v23, %v1468_v54  ;;  %v1743_v61 = vpop.f32.mrf.mxu0  ;;  %v1385_v54 = vadd.f32 %v3783_v42, %v3780_v57  ;;  %v1128_v42 = vld [vmem:[%s4468_s0 + $0x4f8] sm:$0xff] }
 0x2b0   :  { %v1652_v17 = vadd.f32 %v1651_v15, %v1560_v20  ;;  %v1477_v20 = vadd.f32 %v3800_v13, %v1385_v54  ;;  %v1133_v13 = vld [vmem:[%s4468_s0 + $0x520] sm:$0xff] }
 0x2b1   :  { %v1835_v10 = vpop.f32.mrf.mxu1  ;;  %1790 = vmatmul.f32.gmra.mxu0 %v1107_v56 }
 0x2b2   :  { %v1744_v46 = vadd.f32 %v1743_v61, %v1652_v17  ;;  %1609 = vmatmul.f32.gmra.mxu2 %v1112_v41  ;;  %1701 = vmatmul.f32.gmra.mxu3 %v1113_v51 }
 0x2b4   :  { %v1836_v59 = vadd.f32 %v1835_v10, %v1744_v46  ;;  %1882 = vmatmul.f32.gmra.mxu1 %v3669_v40  ;;  %v1120_v40 = vld [vmem:[%s4468_s0 + $0x4b8] sm:$0xff] }
 0x2b5   :  { %v1562_v63 = vpop.f32.mrf.mxu2  ;;  %v1654_v35 = vpop.f32.mrf.mxu3 }
 0x2b6   :  { %2046 = vst.msk [vmem:[%s4469_s2 + $0xe0] sm:$0xff] %vm942_vm0, %v1836_v59  ;;  %v1563_v14 = vadd.f32 %v1562_v63, %v1471_v6  ;;  %v1746_v37 = vpop.f32.mrf.mxu0  ;;  %v1480_v6 = vadd.f32 %v3824_v21, %v1388_v47  ;;  %v1140_v21 = vld [vmem:[%s4468_s0 + $0x558] sm:$0x7] }
 0x2b8   :  { %v1655_v7 = vadd.f32 %v1654_v35, %v1563_v14 }
 0x2b9   :  { %v1838_v48 = vpop.f32.mrf.mxu1  ;;  %1793 = vmatmul.f32.gmra.mxu0 %v1114_v0  ;;  %v4503_v0 = vld [vmem:[#allocation4_spill] sm:$0xff] }
 0x2ba   :  { %v1747_v24 = vadd.f32 %v1746_v37, %v1655_v7  ;;  %1612 = vmatmul.f32.gmra.mxu2 %v1119_v36  ;;  %1704 = vmatmul.f32.gmra.mxu3 %v1120_v40  ;;  %v4502_v37 = vld [vmem:[#allocation3_spill] sm:$0xff] }
 0x2bb   :  { %v1391_v36 = vadd.f32 %v4503_v0, %v4502_v37 }
 0x2bc   :  { %v1839_v34 = vadd.f32 %v1838_v48, %v1747_v24  ;;  %1885 = vmatmul.f32.gmra.mxu1 %v3698_v25  ;;  %v1127_v25 = vld [vmem:[%s4468_s0 + $0x4f0] sm:$0xff] }
 0x2bd   :  { %v1565_v31 = vpop.f32.mrf.mxu2  ;;  %v1657_v60 = vpop.f32.mrf.mxu3  ;;  %v1483_v48 = vadd.f32 %v3847_v16, %v1391_v36 }
 0x2be   :  { %2047 = vst.msk [vmem:[%s4469_s2 + $0xe8] sm:$0xff] %vm942_vm0, %v1839_v34  ;;  %v1566_v11 = vadd.f32 %v1565_v31, %v1474_v9  ;;  %v1749_v5 = vpop.f32.mrf.mxu0  ;;  %v4504_v9 = vld [vmem:[#allocation2_spill] sm:$0xff] }
 0x2c0   :  { %v1658_v29 = vadd.f32 %v1657_v60, %v1566_v11 }
 0x2c1   :  { %v1841_v23 = vpop.f32.mrf.mxu1  ;;  %1796 = vmatmul.f32.gmra.mxu0 %v1121_v30  ;;  %v4505_v30 = vld [vmem:[#allocation5_spill] sm:$0xff] }
 0x2c2   :  { %v1750_v15 = vadd.f32 %v1749_v5, %v1658_v29  ;;  %1615 = vmatmul.f32.gmra.mxu2 %v1126_v52  ;;  %1707 = vmatmul.f32.gmra.mxu3 %v1127_v25  ;;  %v1142_v5 = vld [vmem:[%s4468_s0 + $0x568] sm:$0x7]  ;;  %v4506_v52 = vld [vmem:[#allocation6_spill] sm:$0xff]  ;;  %v1143_v29 = vld [vmem:[%s4468_s0 + $0x570] sm:$0x7] }
 0x2c3   :  { %v1394_v25 = vadd.f32 %v4506_v52, %v4505_v30 }
 0x2c4   :  { %v1842_v61 = vadd.f32 %v1841_v23, %v1750_v15  ;;  %1888 = vmatmul.f32.gmra.mxu1 %v3733_v27  ;;  %v1134_v27 = vld [vmem:[%s4468_s0 + $0x528] sm:$0xff] }
 0x2c5   :  { %v1568_v56 = vpop.f32.mrf.mxu2  ;;  %v1660_v41 = vpop.f32.mrf.mxu3  ;;  %v1486_v15 = vadd.f32 %v3870_v18, %v1394_v25  ;;  %v4513_v25 = vld [vmem:[#allocation13_spill] sm:$0xff] }
 0x2c6   :  { %2048 = vst.msk [vmem:[%s4469_s2 + $0xf0] sm:$0xff] %vm942_vm0, %v1842_v61  ;;  %v1569_v51 = vadd.f32 %v1568_v56, %v1477_v20  ;;  %v1752_v57 = vpop.f32.mrf.mxu0 }
 0x2c8   :  { %v1661_v17 = vadd.f32 %v1660_v41, %v1569_v51 }
 0x2c9   :  { %v1844_v10 = vpop.f32.mrf.mxu1  ;;  %1799 = vmatmul.f32.gmra.mxu0 %v1128_v42  ;;  %v4508_v42 = vld [vmem:[#allocation8_spill] sm:$0xff] }
 0x2ca   :  { %v1753_v46 = vadd.f32 %v1752_v57, %v1661_v17  ;;  %1618 = vmatmul.f32.gmra.mxu2 %v1133_v13  ;;  %1710 = vmatmul.f32.gmra.mxu3 %v1134_v27  ;;  %v4507_v57 = vld [vmem:[#allocation7_spill] sm:$0xff] }
 0x2cb   :  { %v1397_v13 = vadd.f32 %v4508_v42, %v4507_v57  ;;  %v4515_v57 = vld [vmem:[#allocation15_spill] sm:$0xff]  ;;  %v4516_v42 = vld [vmem:[#allocation16_spill] sm:$0xff] }
 0x2cc   :  { %v1845_v59 = vadd.f32 %v1844_v10, %v1753_v46  ;;  %1891 = vmatmul.f32.gmra.mxu1 %v3765_v1  ;;  %v1141_v1 = vld [vmem:[%s4468_s0 + $0x560] sm:$0x7] }
 0x2cd   :  { %v1571_v63 = vpop.f32.mrf.mxu2  ;;  %v1663_v35 = vpop.f32.mrf.mxu3  ;;  %v1489_v10 = vadd.f32 %v3893_v28, %v1397_v13  ;;  %v1409_v13 = vadd.f32 %v4516_v42, %v4515_v57 }
 0x2ce   :  { %2049 = vst.msk [vmem:[%s4469_s2 + $0xf8] sm:$0xff] %vm942_vm0, %v1845_v59  ;;  %v1572_v14 = vadd.f32 %v1571_v63, %v1480_v6  ;;  %v1755_v2 = vpop.f32.mrf.mxu0 }
 0x2d0   :  { %v1664_v40 = vadd.f32 %v1663_v35, %v1572_v14  ;;  %v4509_v35 = vld [vmem:[#allocation9_spill] sm:$0xff]  ;;  %v4510_v14 = vld [vmem:[#allocation10_spill] sm:$0xff] }
 0x2d1   :  { %v1847_v12 = vpop.f32.mrf.mxu1  ;;  %1802 = vmatmul.f32.gmra.mxu0 %v1135_v43 }
 0x2d2   :  { %v1756_v7 = vadd.f32 %v1755_v2, %v1664_v40  ;;  %1621 = vmatmul.f32.gmra.mxu2 %v1140_v21  ;;  %1713 = vmatmul.f32.gmra.mxu3 %v1141_v1  ;;  %v1400_v2 = vadd.f32 %v4510_v14, %v4509_v35  ;;  %v4518_v35 = vld [vmem:[#allocation18_spill] sm:$0xff] }
 0x2d4   :  { %v1848_v24 = vadd.f32 %v1847_v12, %v1756_v7  ;;  %1894 = vmatmul.f32.gmra.mxu1 %v4504_v9  ;;  %v1492_v37 = vadd.f32 %v3916_v8, %v1400_v2  ;;  %v4511_v7 = vld [vmem:[#allocation11_spill] sm:$0xff] }
 0x2d5   :  { %v1574_v34 = vpop.f32.mrf.mxu2  ;;  %v1666_v31 = vpop.f32.mrf.mxu3 }
 0x2d6   :  { %2050 = vst.msk [vmem:[%s4469_s2 + $0x100] sm:$0xff] %vm942_vm0, %v1848_v24  ;;  %v1575_v60 = vadd.f32 %v1574_v34, %v1483_v48  ;;  %v1758_v11 = vpop.f32.mrf.mxu0  ;;  %v4512_v48 = vld [vmem:[#allocation12_spill] sm:$0xff] }
 0x2d7   :  { %v1403_v24 = vadd.f32 %v4512_v48, %v4511_v7 }
 0x2d8   :  { %v1667_v16 = vadd.f32 %v1666_v31, %v1575_v60 }
 0x2d9   :  { %v1850_v54 = vpop.f32.mrf.mxu1  ;;  %1805 = vmatmul.f32.gmra.mxu0 %v1142_v5  ;;  %v1495_v60 = vadd.f32 %v3939_v53, %v1403_v24 }
 0x2da   :  { %v1759_v23 = vadd.f32 %v1758_v11, %v1667_v16  ;;  %v4514_v16 = vld [vmem:[#allocation14_spill] sm:$0xff] }
 0x2dc   :  { %v1851_v20 = vadd.f32 %v1850_v54, %v1759_v23  ;;  %1897 = vmatmul.f32.gmra.mxu1 %v1143_v29  ;;  %v1406_v54 = vadd.f32 %v4514_v16, %v4513_v25 }
 0x2dd   :  { %v1577_v61 = vpop.f32.mrf.mxu2  ;;  %v1669_v56 = vpop.f32.mrf.mxu3 }
 0x2de   :  { %2051 = vst.msk [vmem:[%s4469_s2 + $0x108] sm:$0xff] %vm942_vm0, %v1851_v20  ;;  %v1578_v41 = vadd.f32 %v1577_v61, %v1486_v15  ;;  %v1761_v51 = vpop.f32.mrf.mxu0  ;;  %v1498_v20 = vadd.f32 %v3962_v55, %v1406_v54 }
 0x2e0   :  { %v1670_v27 = vadd.f32 %v1669_v56, %v1578_v41 }
 0x2e1   :  { %v1853_v47 = vpop.f32.mrf.mxu1 }
 0x2e2   :  { %v1762_v17 = vadd.f32 %v1761_v51, %v1670_v27 }
 0x2e4   :  { %v1854_v18 = vadd.f32 %v1853_v47, %v1762_v17 }
 0x2e5   :  { %v1580_v46 = vpop.f32.mrf.mxu2  ;;  %v1672_v6 = vpop.f32.mrf.mxu3 }
 0x2e6   :  { %2052 = vst.msk [vmem:[%s4469_s2 + $0x110] sm:$0xff] %vm942_vm0, %v1854_v18  ;;  %v1581_v59 = vadd.f32 %v1580_v46, %v1489_v10  ;;  %v1764_v63 = vpop.f32.mrf.mxu0  ;;  %v1501_v10 = vadd.f32 %v3985_v19, %v1409_v13 }
 0x2e8   :  { %v1673_v43 = vadd.f32 %v1672_v6, %v1581_v59 }
 0x2e9   :  { %v1856_v21 = vpop.f32.mrf.mxu1 }
 0x2ea   :  { %v1765_v1 = vadd.f32 %v1764_v63, %v1673_v43  ;;  %v4517_v63 = vld [vmem:[#allocation17_spill] sm:$0xff] }
 0x2eb   :  { %v1412_v14 = vadd.f32 %v4518_v35, %v4517_v63 }
 0x2ec   :  { %v1857_v0 = vadd.f32 %v1856_v21, %v1765_v1 }
 0x2ed   :  { %v1583_v28 = vpop.f32.mrf.mxu2  ;;  %v1675_v36 = vpop.f32.mrf.mxu3  ;;  %v1504_v1 = vadd.f32 %v4008_v38, %v1412_v14 }
 0x2ee   :  { %2053 = vst.msk [vmem:[%s4469_s2 + $0x118] sm:$0xff] %vm942_vm0, %v1857_v0  ;;  %v1584_v40 = vadd.f32 %v1583_v28, %v1492_v37  ;;  %v1767_v12 = vpop.f32.mrf.mxu0 }
 0x2f0   :  { %v1676_v9 = vadd.f32 %v1675_v36, %v1584_v40  ;;  %v4519_v40 = vld [vmem:[#allocation19_spill] sm:$0xff] }
 0x2f1   :  { %v1859_v34 = vpop.f32.mrf.mxu1 }
 0x2f2   :  { %v1768_v31 = vadd.f32 %v1767_v12, %v1676_v9  ;;  %v4520_v12 = vld [vmem:[#allocation20_spill] sm:$0xff] }
 0x2f3   :  { %v1415_v7 = vadd.f32 %v4520_v12, %v4519_v40 }
 0x2f4   :  { %v1860_v11 = vadd.f32 %v1859_v34, %v1768_v31 }
 0x2f5   :  { %v1586_v8 = vpop.f32.mrf.mxu2  ;;  %v1678_v5 = vpop.f32.mrf.mxu3  ;;  %v1507_v34 = vadd.f32 %v4031_v4, %v1415_v7  ;;  %v4527_v7 = vld [vmem:[#allocation27_spill] sm:$0xff] }
 0x2f6   :  { %2054 = vst.msk [vmem:[%s4469_s2 + $0x120] sm:$0xff] %vm942_vm0, %v1860_v11  ;;  %v1587_v30 = vadd.f32 %v1586_v8, %v1495_v60  ;;  %v1770_v52 = vpop.f32.mrf.mxu0 }
 0x2f8   :  { %v1679_v29 = vadd.f32 %v1678_v5, %v1587_v30  ;;  %v4521_v5 = vld [vmem:[#allocation21_spill] sm:$0xff]  ;;  %v4522_v30 = vld [vmem:[#allocation22_spill] sm:$0xff] }
 0x2f9   :  { %v1862_v23 = vpop.f32.mrf.mxu1 }
 0x2fa   :  { %v1771_v15 = vadd.f32 %v1770_v52, %v1679_v29  ;;  %v1418_v52 = vadd.f32 %v4522_v30, %v4521_v5 }
 0x2fc   :  { %v1863_v61 = vadd.f32 %v1862_v23, %v1771_v15  ;;  %v1510_v29 = vadd.f32 %v4054_v49, %v1418_v52 }
 0x2fd   :  { %v1589_v53 = vpop.f32.mrf.mxu2  ;;  %v1681_v56 = vpop.f32.mrf.mxu3 }
 0x2fe   :  { %2055 = vst.msk [vmem:[%s4469_s2 + $0x128] sm:$0xff] %vm942_vm0, %v1863_v61  ;;  %v1590_v41 = vadd.f32 %v1589_v53, %v1498_v20  ;;  %v1773_v51 = vpop.f32.mrf.mxu0  ;;  %v4523_v53 = vld [vmem:[#allocation23_spill] sm:$0xff] }
 0x300   :  { %v1682_v27 = vadd.f32 %v1681_v56, %v1590_v41  ;;  %v4524_v56 = vld [vmem:[#allocation24_spill] sm:$0xff] }
 0x301   :  { %v1865_v47 = vpop.f32.mrf.mxu1  ;;  %v1421_v41 = vadd.f32 %v4524_v56, %v4523_v53 }
 0x302   :  { %v1774_v17 = vadd.f32 %v1773_v51, %v1682_v27 }
 0x303   :  { %v1513_v13 = vadd.f32 %v4077_v26, %v1421_v41 }
 0x304   :  { %v1866_v18 = vadd.f32 %v1865_v47, %v1774_v17 }
 0x305   :  { %v1592_v55 = vpop.f32.mrf.mxu2  ;;  %v1684_v46 = vpop.f32.mrf.mxu3 }
 0x306   :  { %2056 = vst.msk [vmem:[%s4469_s2 + $0x130] sm:$0xff] %vm942_vm0, %v1866_v18  ;;  %v1593_v6 = vadd.f32 %v1592_v55, %v1501_v10  ;;  %v1776_v59 = vpop.f32.mrf.mxu0  ;;  %v4525_v18 = vld [vmem:[#allocation25_spill] sm:$0xff] }
 0x307   :  { %v1424_v55 = vadd.f32 %v4525_v18, %v4080_v44 }
 0x308   :  { %v1685_v2 = vadd.f32 %v1684_v46, %v1593_v6 }
 0x309   :  { %v1868_v43 = vpop.f32.mrf.mxu1  ;;  %v1516_v63 = vadd.f32 %v4098_v50, %v1424_v55 }
 0x30a   :  { %v1777_v21 = vadd.f32 %v1776_v59, %v1685_v2 }
 0x30c   :  { %v1869_v37 = vadd.f32 %v1868_v43, %v1777_v21  ;;  %v4526_v21 = vld [vmem:[#allocation26_spill] sm:$0xff] }
 0x30d   :  { %v1595_v19 = vpop.f32.mrf.mxu2  ;;  %v1687_v0 = vpop.f32.mrf.mxu3 }
 0x30e   :  { %2057 = vst.msk [vmem:[%s4469_s2 + $0x138] sm:$0xff] %vm942_vm0, %v1869_v37  ;;  %v1596_v28 = vadd.f32 %v1595_v19, %v1504_v1  ;;  %v1779_v36 = vpop.f32.mrf.mxu0  ;;  %v1427_v1 = vadd.f32 %v4526_v21, %v4101_v39 }
 0x310   :  { %v1688_v48 = vadd.f32 %v1687_v0, %v1596_v28  ;;  %v1519_v0 = vadd.f32 %v4119_v33, %v1427_v1 }
 0x311   :  { %v1871_v24 = vpop.f32.mrf.mxu1 }
 0x312   :  { %v1780_v9 = vadd.f32 %v1779_v36, %v1688_v48  ;;  %v1430_v48 = vadd.f32 %v4527_v7, %v4122_v22 }
 0x314   :  { %v1872_v31 = vadd.f32 %v1871_v24, %v1780_v9 }
 0x315   :  { %v1598_v38 = vpop.f32.mrf.mxu2  ;;  %v1690_v60 = vpop.f32.mrf.mxu3 }
 0x316   :  { %2058 = vst.msk [vmem:[%s4469_s2 + $0x140] sm:$0xff] %vm942_vm0, %v1872_v31  ;;  %v1599_v11 = vadd.f32 %v1598_v38, %v1507_v34  ;;  %v1782_v8 = vpop.f32.mrf.mxu0  ;;  %v1522_v34 = vadd.f32 %v4140_v62, %v1430_v48 }
 0x318   :  { %v1691_v25 = vadd.f32 %v1690_v60, %v1599_v11 }
 0x319   :  { %v1874_v16 = vpop.f32.mrf.mxu1 }
 0x31a   :  { %v1783_v54 = vadd.f32 %v1782_v8, %v1691_v25  ;;  %v4528_v8 = vld [vmem:[#allocation28_spill] sm:$0xff] }
 0x31b   :  { %v1433_v5 = vadd.f32 %v4528_v8, %v4143_v3 }
 0x31c   :  { %v1875_v23 = vadd.f32 %v1874_v16, %v1783_v54 }
 0x31d   :  { %v1601_v4 = vpop.f32.mrf.mxu2  ;;  %v1693_v15 = vpop.f32.mrf.mxu3  ;;  %v1525_v25 = vadd.f32 %v4161_v45, %v1433_v5 }
 0x31e   :  { %2059 = vst.msk [vmem:[%s4469_s2 + $0x148] sm:$0xff] %vm942_vm0, %v1875_v23  ;;  %v1602_v20 = vadd.f32 %v1601_v4, %v1510_v29  ;;  %v1785_v61 = vpop.f32.mrf.mxu0  ;;  %v4529_v4 = vld [vmem:[#allocation29_spill] sm:$0xff] }
 0x320   :  { %v1694_v51 = vadd.f32 %v1693_v15, %v1602_v20  ;;  %v1436_v15 = vadd.f32 %v4529_v4, %v4164_v32 }
 0x321   :  { %v1877_v57 = vpop.f32.mrf.mxu1 }
 0x322   :  { %v1786_v42 = vadd.f32 %v1785_v61, %v1694_v51  ;;  %v1528_v53 = vadd.f32 %v4182_v58, %v1436_v15 }
 0x324   :  { %v1878_v27 = vadd.f32 %v1877_v57, %v1786_v42  ;;  %v4530_v42 = vld [vmem:[#allocation30_spill] sm:$0xff] }
 0x325   :  { %v1604_v49 = vpop.f32.mrf.mxu2  ;;  %v1696_v47 = vpop.f32.mrf.mxu3 }
 0x326   :  { %2060 = vst.msk [vmem:[%s4469_s2 + $0x150] sm:$0xff] %vm942_vm0, %v1878_v27  ;;  %v1605_v17 = vadd.f32 %v1604_v49, %v1513_v13  ;;  %v1788_v10 = vpop.f32.mrf.mxu0  ;;  %v4531_v13 = vld [vmem:[#allocation31_spill] sm:$0xff] }
 0x327   :  { %v1439_v27 = vadd.f32 %v4531_v13, %v4530_v42 }
 0x328   :  { %v1697_v46 = vadd.f32 %v1696_v47, %v1605_v17  ;;  %v4532_v17 = vld [vmem:[#allocation32_spill] sm:$0xff] }
 0x329   :  { %v1880_v6 = vpop.f32.mrf.mxu1 }
 0x32a   :  { %v1789_v59 = vadd.f32 %v1788_v10, %v1697_v46  ;;  %v1531_v10 = vadd.f32 %v4532_v17, %v1439_v27 }
 0x32c   :  { %v1881_v35 = vadd.f32 %v1880_v6, %v1789_v59 }
 0x32d   :  { %v1607_v26 = vpop.f32.mrf.mxu2  ;;  %v1699_v14 = vpop.f32.mrf.mxu3 }
 0x32e   :  { %2061 = vst.msk [vmem:[%s4469_s2 + $0x158] sm:$0xff] %vm942_vm0, %v1881_v35  ;;  %v1608_v2 = vadd.f32 %v1607_v26, %v1516_v63  ;;  %v1791_v43 = vpop.f32.mrf.mxu0 }
 0x330   :  { %v1700_v37 = vadd.f32 %v1699_v14, %v1608_v2 }
 0x331   :  { %v1883_v44 = vpop.f32.mrf.mxu1 }
 0x332   :  { %v1792_v19 = vadd.f32 %v1791_v43, %v1700_v37 }
 0x334   :  { %v1884_v28 = vadd.f32 %v1883_v44, %v1792_v19 }
 0x335   :  { %v1610_v50 = vpop.f32.mrf.mxu2  ;;  %v1702_v36 = vpop.f32.mrf.mxu3 }
 0x336   :  { %2062 = vst.msk [vmem:[%s4469_s2 + $0x160] sm:$0xff] %vm942_vm0, %v1884_v28  ;;  %v1611_v40 = vadd.f32 %v1610_v50, %v1519_v0  ;;  %v1794_v12 = vpop.f32.mrf.mxu0 }
 0x338   :  { %v1703_v24 = vadd.f32 %v1702_v36, %v1611_v40 }
 0x339   :  { %v1886_v39 = vpop.f32.mrf.mxu1 }
 0x33a   :  { %v1795_v9 = vadd.f32 %v1794_v12, %v1703_v24 }
 0x33c   :  { %v1887_v31 = vadd.f32 %v1886_v39, %v1795_v9 }
 0x33d   :  { %v1613_v33 = vpop.f32.mrf.mxu2  ;;  %v1705_v38 = vpop.f32.mrf.mxu3 }
 0x33e   :  { %2063 = vst.msk [vmem:[%s4469_s2 + $0x168] sm:$0xff] %vm942_vm0, %v1887_v31  ;;  %v1614_v60 = vadd.f32 %v1613_v33, %v1522_v34  ;;  %v1797_v11 = vpop.f32.mrf.mxu0 }
 0x340   :  { %v1706_v30 = vadd.f32 %v1705_v38, %v1614_v60 }
 0x341   :  { %v1889_v22 = vpop.f32.mrf.mxu1 }
 0x342   :  { %v1798_v52 = vadd.f32 %v1797_v11, %v1706_v30 }
 0x344   :  { %v1890_v16 = vadd.f32 %v1889_v22, %v1798_v52 }
 0x345   :  { %v1616_v62 = vpop.f32.mrf.mxu2  ;;  %v1708_v54 = vpop.f32.mrf.mxu3 }
 0x346   :  { %2064 = vst.msk [vmem:[%s4469_s2 + $0x170] sm:$0xff] %vm942_vm0, %v1890_v16  ;;  %v1617_v29 = vadd.f32 %v1616_v62, %v1525_v25  ;;  %v1800_v23 = vpop.f32.mrf.mxu0 }
 0x348   :  { %v1709_v20 = vadd.f32 %v1708_v54, %v1617_v29 }
 0x349   :  { %v1892_v3 = vpop.f32.mrf.mxu1 }
 0x34a   :  { %v1801_v61 = vadd.f32 %v1800_v23, %v1709_v20 }
 0x34c   :  { %v1893_v56 = vadd.f32 %v1892_v3, %v1801_v61 }
 0x34d   :  { %v1619_v45 = vpop.f32.mrf.mxu2  ;;  %v1711_v41 = vpop.f32.mrf.mxu3 }
 0x34e   :  { %2065 = vst.msk [vmem:[%s4469_s2 + $0x178] sm:$0xff] %vm942_vm0, %v1893_v56  ;;  %v1620_v51 = vadd.f32 %v1619_v45, %v1528_v53  ;;  %v1803_v57 = vpop.f32.mrf.mxu0 }
 0x350   :  { %v1712_v49 = vadd.f32 %v1711_v41, %v1620_v51 }
 0x351   :  { %v1895_v32 = vpop.f32.mrf.mxu1 }
 0x352   :  { %v1804_v47 = vadd.f32 %v1803_v57, %v1712_v49 }
 0x354   :  { %v1896_v18 = vadd.f32 %v1895_v32, %v1804_v47 }
 0x355   :  { %v1622_v58 = vpop.f32.mrf.mxu2  ;;  %v1714_v55 = vpop.f32.mrf.mxu3 }
 0x356   :  { %2066 = vst.msk [vmem:[%s4469_s2 + $0x180] sm:$0xff] %vm942_vm0, %v1896_v18  ;;  %v1623_v46 = vadd.f32 %v1622_v58, %v1531_v10  ;;  %v1806_v6 = vpop.f32.mrf.mxu0 }
 0x358   :  { %v1715_v59 = vadd.f32 %v1714_v55, %v1623_v46 }
 0x359   :  { %v1898_v63 = vpop.f32.mrf.mxu1 }
 0x35a   :  { %v1807_v35 = vadd.f32 %v1806_v6, %v1715_v59 }
 0x35c   :  { %v1899_v26 = vadd.f32 %v1898_v63, %v1807_v35 }
 0x35e   :  { %2067 = vst.msk [vmem:[%s4469_s2 + $0x188] sm:$0x7] %vm967_vm1, %v1899_v26 }

</bundles_post_ra>
